<compile_context>
chip_gen: v6e
topology: v6e:2x2x1
jax: 0.10.0
libtpu: 0.0.40
codegen_flags: <defaults>
</compile_context>

<pallas_src>
import math
import functools

import jax
import jax.numpy as jnp
from jax import lax
from jax.experimental import pallas as pl
from jax.experimental.pallas import tpu as pltpu


def _round_up(a, b):
    return (a + b - 1) // b * b


def _cdiv(a, b):
    return -(-a // b)


# ----------------------------------------------------------------------------
# VMEM limit/budget, queried from the device (fallback: v7x-safe 64 MiB physical).
# ----------------------------------------------------------------------------
_VMEM_CACHE = None


def _vmem_limits():
    global _VMEM_CACHE
    if _VMEM_CACHE is None:
        cap = None
        try:
            info = pltpu.get_tpu_info()
            cap = int(getattr(info, "vmem_capacity_bytes", 0) or 0)
        except Exception:
            cap = 0
        if not cap:
            cap = 64 * 1024 * 1024              # conservative (v7x per-core VMEM)
        limit = cap * 3 // 4                    # scoped-VMEM limit we request
        budget = limit * 3 // 4                 # operand budget for the tile pickers
        _VMEM_CACHE = (limit, budget)
    return _VMEM_CACHE


# ----------------------------------------------------------------------------
# Hypernet weight generators (parameter-setup glue, plain JAX).
# The PyTorch HypernetWeight draws torch.randn noise on CUDA; here the noise and
# the MLP weights are generated deterministically from a PRNG key.
# ----------------------------------------------------------------------------
def init_hypernet(key, out_len, units=(16, 32, 64), noise_shape=1):
    dims = [noise_shape] + list(units) + [out_len]
    params = []
    for i in range(len(dims) - 1):
        key, kw, kb = jax.random.split(key, 3)
        bound = 1.0 / math.sqrt(dims[i])
        W = jax.random.uniform(kw, (dims[i + 1], dims[i]), jnp.float32, -bound, bound)
        b = jax.random.uniform(kb, (dims[i + 1],), jnp.float32, -bound, bound)
        params.append((W, b))
    return params


def hypernet_forward(params, noise):
    h = noise                                   # (1, noise_shape)
    for W, b in params[:-1]:
        h = h @ W.T + b
        h = jnp.where(h >= 0, h, 0.1 * h)       # LeakyReLU(0.1)
    W, b = params[-1]
    return (h @ W.T + b)[0]                     # sample 0


def hypernet_sample(key, shape, units=(16, 32, 64), noise_shape=1):
    kp, kn = jax.random.split(key)
    params = init_hypernet(kp, int(math.prod(shape)), units, noise_shape)
    noise = jax.random.normal(kn, (1, noise_shape), dtype=jnp.float32)
    return hypernet_forward(params, noise).reshape(shape)


def init_block_params(key, in_planes, planes):
    ks = jax.random.split(key, 14)
    p = {}
    p["conv1_w"] = hypernet_sample(ks[0], (planes * 3 * 3 * in_planes, 1)).reshape(
        planes, in_planes, 3, 3)
    p["conv1_b"] = hypernet_sample(ks[1], (planes,))
    p["conv1_gain"] = hypernet_sample(ks[2], (planes,))
    p["conv2_w"] = hypernet_sample(ks[3], (planes * 3 * 3 * planes, 1)).reshape(
        planes, planes, 3, 3)
    p["conv2_b"] = hypernet_sample(ks[4], (planes,))
    p["conv2_gain"] = hypernet_sample(ks[5], (planes,))
    p["sc_w"] = hypernet_sample(ks[6], (planes * 1 * 1 * in_planes, 1)).reshape(
        planes, in_planes, 1, 1)
    p["sc_b"] = hypernet_sample(ks[7], (planes,))
    p["sc_gain"] = hypernet_sample(ks[8], (planes,))
    p["se1_w"] = hypernet_sample(ks[9], (planes * planes, 1)).reshape(planes, planes, 1, 1)
    p["se1_b"] = hypernet_sample(ks[10], (planes,))
    p["se2_w"] = hypernet_sample(ks[11], (planes * planes, 1)).reshape(planes, planes, 1, 1)
    p["se2_b"] = hypernet_sample(ks[12], (planes,))
    p["skipinit_gain"] = hypernet_sample(ks[13], (1,))
    return p


# ----------------------------------------------------------------------------
# ScaledWS weight standardization (plain JAX; tiny op, XLA fuses it).
# Matches the reference: unbiased torch.var, denominator sqrt(var*fan_in + eps).
# ----------------------------------------------------------------------------
def ws_standardize(weight_oihw, gain, eps=1e-4):
    w = weight_oihw.astype(jnp.float32)
    c_out = w.shape[0]
    fan_in = int(math.prod(w.shape[1:]))
    mean = jnp.mean(w, axis=(1, 2, 3), keepdims=True)
    var = jnp.sum((w - mean) ** 2, axis=(1, 2, 3), keepdims=True) / (fan_in - 1)
    w = (w - mean) / jnp.sqrt(var * fan_in + eps)
    return w * gain.reshape(c_out, 1, 1, 1).astype(jnp.float32)


# ----------------------------------------------------------------------------
# Weight packing helpers (no channel padding: true channel widths everywhere).
# ----------------------------------------------------------------------------
def pack_conv_weight_matmul(w_oihw, dtype=jnp.bfloat16):
    """(O, I, kh, kw) -> (I*kh*kw, O): K ordered (c_in, kh, kw), matching
    lax.conv_general_dilated_patches' channel-major patch ordering."""
    c_out = w_oihw.shape[0]
    return w_oihw.astype(jnp.float32).reshape(c_out, -1).T.astype(dtype)


def pack_conv_weight_taps(w_oihw, dtype=jnp.bfloat16):
    """(O, I, 3, 3) -> (9, I, O): per-tap (dh*3+dw) operands for the in-kernel
    shifted-window conv2."""
    o, i = w_oihw.shape[0], w_oihw.shape[1]
    return jnp.transpose(w_oihw.astype(jnp.float32), (2, 3, 1, 0)).reshape(9, i, o).astype(dtype)


def pack_bias(b):
    return b.astype(jnp.float32).reshape(1, -1)


def extract_patches(x_nhwc, k, stride, pad):
    """im2col via one fused XLA gather on the UNPADDED channel count.
    Output feature ordering is channel-major (c, kh, kw)."""
    p = lax.conv_general_dilated_patches(
        x_nhwc, filter_shape=(k, k), window_strides=(stride, stride),
        padding=((pad, pad), (pad, pad)),
        dimension_numbers=("NHWC", "HWIO", "NHWC"))
    n, ho, wo, kc = p.shape
    return p.reshape(n * ho * wo, kc), (ho, wo)


def _pad_rows(a, mp):
    return a if a.shape[0] == mp else jnp.pad(a, ((0, mp - a.shape[0]), (0, 0)))


def _pick_tm(n_rows, stream_bytes_per_row, fixed_bytes, budget,
             row_align=8, min_steps=4, cap=1024):
    """Largest row tile (multiple of row_align, <= cap) that (a) leaves >= min_steps
    grid steps when the problem allows it (>= 2 per TensorCore on a 2-TC chip) and
    (b) keeps the double-buffered streamed operands under the VMEM budget."""
    tm = min(cap, _round_up(max(n_rows // min_steps, row_align), row_align))
    while tm > row_align and 2 * tm * stream_bytes_per_row + fixed_bytes > budget:
        tm = max(row_align, _round_up(tm // 2, row_align))
    return tm


def _pick_tail_rows(n, ho, wo_r, c_mid, c_out, c_sc, sc_isz, fixed_bytes, budget):
    """Output-row tile for the fused tail: prefer >= 4 total grid steps, stay under
    the VMEM budget (streamed blocks double-buffered)."""
    n_tiles = max(1, min(ho, _cdiv(4, n)))
    th = _cdiv(ho, n_tiles)

    def step_bytes(th_):
        x1 = (th_ + 2) * (wo_r + 2) * c_mid * 2            # bf16 halo block
        rows = th_ * wo_r
        return 2 * (x1 + rows * (c_out * 4 + c_sc * sc_isz))

    while th > 1 and step_bytes(th) + fixed_bytes > budget:
        th = _cdiv(th, 2)
    n_tiles = _cdiv(ho, th)
    return th, n_tiles


# ----------------------------------------------------------------------------
# Pallas kernel 1: conv1 (3x3, stride s) as matmul over im2col patches with fused
# post-ReLU (the reference feeds activation(conv1(.)) into conv2; conv1's raw
# output is not used anywhere else). bf16 MXU feed, f32 accumulate, bf16 output.
# ----------------------------------------------------------------------------
def _conv_bias_relu_kernel(p_ref, w_ref, b_ref, o_ref):
    y = jnp.dot(p_ref[...], w_ref[...], preferred_element_type=jnp.float32) + b_ref[...]
    o_ref[...] = jnp.maximum(y, 0.0).astype(o_ref.dtype)


def conv_bias_relu(patches_b, w_t, bias_row, out_dtype=jnp.bfloat16):
    m, k = patches_b.shape
    c_out = w_t.shape[1]
    limit, budget = _vmem_limits()
    out_isz = jnp.dtype(out_dtype).itemsize
    # Constant-index weight/bias blocks are still double-buffered by Pallas: count 2x.
    fixed = 2 * (k * c_out * 2 + c_out * 4)
    tm = _pick_tm(m, k * 2 + c_out * out_isz, fixed, budget,
                  row_align=16 if out_isz == 2 else 8)
    mp = _round_up(m, tm)
    out = pl.pallas_call(
        _conv_bias_relu_kernel,
        out_shape=jax.ShapeDtypeStruct((mp, c_out), out_dtype),
        grid=(mp // tm,),
        in_specs=[pl.BlockSpec((tm, k), lambda i: (i, 0)),
                  pl.BlockSpec((k, c_out), lambda i: (0, 0)),
                  pl.BlockSpec((1, c_out), lambda i: (0, 0))],
        out_specs=pl.BlockSpec((tm, c_out), lambda i: (i, 0)),
        compiler_params=pltpu.CompilerParams(
            dimension_semantics=("parallel",),
            vmem_limit_bytes=limit),
    )(_pad_rows(patches_b, mp), w_t, bias_row)
    return out[:m]


# ----------------------------------------------------------------------------
# Pallas kernel 2 (fused tail): in-kernel conv2 (nine shifted-window matmuls over a
# halo row tile of relu(conv1) — no materialized im2col) + (optional) 1x1 shortcut
# conv + SqueezeExcite + skipinit residual, all in one pass over the tile.
# NOTE: the reference SqueezeExcite computes a spatial mean but immediately
# overwrites it (dead code); the 1x1 SE convs act on the full spatial map, which is
# what is reproduced here.
# ----------------------------------------------------------------------------
def _fused_tail_kernel(*refs, sc_conv, th, wo_r, c_mid):
    if sc_conv:
        (x1_ref, w2_ref, b2_ref, sw1_ref, sb1_ref, sw2_ref, sb2_ref,
         scx_ref, scw_ref, scb_ref, g_ref, o_ref) = refs
    else:
        (x1_ref, w2_ref, b2_ref, sw1_ref, sb1_ref, sw2_ref, sb2_ref,
         sc_ref, g_ref, o_ref) = refs

    m = th * wo_r
    c_out = w2_ref.shape[2]

    # conv2: 3x3 stride-1 as nine shifted-window matmuls, accumulated in f32.
    # (Windows sliced/reshaped in f32 for robust layout handling, bf16 MXU feed.)
    x1 = x1_ref[...].astype(jnp.float32)                 # (th+2, wo_r+2, c_mid)
    acc = jnp.zeros((m, c_out), jnp.float32)
    for dh in range(3):
        for dw in range(3):
            win = x1[dh:dh + th, dw:dw + wo_r, :]         # (th, wo_r, c_mid)
            lhs = win.reshape(m, c_mid).astype(jnp.bfloat16)
            acc = acc + jnp.dot(lhs, w2_ref[dh * 3 + dw],
                                preferred_element_type=jnp.float32)
    out2 = acc + b2_ref[...]

    # shortcut: fused 1x1 ScaledWS conv on relu(x)/beta rows, or identity rows.
    if sc_conv:
        shortcut = jnp.dot(scx_ref[...], scw_ref[...],
                           preferred_element_type=jnp.float32) + scb_ref[...]
    else:
        shortcut = sc_ref[...].astype(jnp.float32)

    # SqueezeExcite: sigmoid(conv(relu(conv(out2)))) * 2 * out2.
    res = jnp.maximum(
        jnp.dot(out2.astype(jnp.bfloat16), sw1_ref[...],
                preferred_element_type=jnp.float32) + sb1_ref[...], 0.0)
    h = jnp.dot(res.astype(jnp.bfloat16), sw2_ref[...],
                preferred_element_type=jnp.float32) + sb2_ref[...]
    se_out = jax.nn.sigmoid(h) * 2.0 * out2

    o_ref[...] = se_out * g_ref[0, 0] + shortcut


def fused_tail(x1_halo, sc_rows, w2_taps, b2_row, se_w1_t, se_b1_row,
               se_w2_t, se_b2_row, gain_alpha, th, wo_r,
               sc_w_t=None, sc_b_row=None, vmem_limit=None):
    g, thp2, wp2, c_mid = x1_halo.shape
    c_out = w2_taps.shape[2]
    c_sc = sc_rows.shape[2]
    m = th * wo_r
    sc_conv = sc_w_t is not None

    in_specs = [
        pl.BlockSpec((None, thp2, wp2, c_mid), lambda i: (i, 0, 0, 0)),
        pl.BlockSpec((9, c_mid, c_out), lambda i: (0, 0, 0)),
        pl.BlockSpec((1, c_out), lambda i: (0, 0)),
        pl.BlockSpec((c_out, c_out), lambda i: (0, 0)),
        pl.BlockSpec((1, c_out), lambda i: (0, 0)),
        pl.BlockSpec((c_out, c_out), lambda i: (0, 0)),
        pl.BlockSpec((1, c_out), lambda i: (0, 0)),
        pl.BlockSpec((None, m, c_sc), lambda i: (i, 0, 0)),
    ]
    args = [x1_halo, w2_taps, b2_row, se_w1_t, se_b1_row, se_w2_t, se_b2_row, sc_rows]
    if sc_conv:
        in_specs += [pl.BlockSpec((c_sc, c_out), lambda i: (0, 0)),
                     pl.BlockSpec((1, c_out), lambda i: (0, 0))]
        args += [sc_w_t, sc_b_row]
    in_specs += [pl.BlockSpec(memory_space=pltpu.MemorySpace.SMEM)]
    args += [jnp.reshape(gain_alpha, (1, 1)).astype(jnp.float32)]

    kernel = functools.partial(_fused_tail_kernel, sc_conv=sc_conv,
                               th=th, wo_r=wo_r, c_mid=c_mid)
    return pl.pallas_call(
        kernel,
        out_shape=jax.ShapeDtypeStruct((g, m, c_out), jnp.float32),
        grid=(g,),
        in_specs=in_specs,
        out_specs=pl.BlockSpec((None, m, c_out), lambda i: (i, 0, 0)),
        compiler_params=pltpu.CompilerParams(
            dimension_semantics=("parallel",),
            vmem_limit_bytes=vmem_limit),
    )(*args)


# ----------------------------------------------------------------------------
# NF_BasicBlock forward
# ----------------------------------------------------------------------------
def nf_basic_block_forward(x_nchw, params, *, in_planes, planes, stride=1,
                           beta=1.0, alpha=1.0, output_nchw=True):
    n, c_in, h, w = x_nchw.shape
    assert c_in == in_planes
    limit, budget = _vmem_limits()

    x = jnp.transpose(x_nchw, (0, 2, 3, 1)).astype(jnp.float32)       # NHWC
    # out = activation(x) / beta, computed once on x (matches reference op order).
    a = jnp.maximum(x, 0.0) / beta
    a_b = a.astype(jnp.bfloat16)

    # ---- conv1: ScaledWSConv2d 3x3 (stride, pad=1) + fused post-ReLU.
    w1_t = pack_conv_weight_matmul(ws_standardize(params["conv1_w"], params["conv1_gain"]))
    b1 = pack_bias(params["conv1_b"])
    patches1, (ho, wo) = extract_patches(a_b, 3, stride, 1)            # K = c_in*9
    out1_act = conv_bias_relu(patches1, w1_t, b1)                      # (N*Ho*Wo, planes) bf16
    out1_act = out1_act.reshape(n, ho, wo, planes)

    # ---- fused tail operands.
    wo_r = _round_up(wo, 8)     # width padded so the in-kernel window collapse is tile-aligned
    w2_taps = pack_conv_weight_taps(ws_standardize(params["conv2_w"], params["conv2_gain"]))
    b2 = pack_bias(params["conv2_b"])
    se_w1_t = pack_conv_weight_matmul(params["se1_w"])                 # SE convs: no WS
    se_b1 = pack_bias(params["se1_b"])
    se_w2_t = pack_conv_weight_matmul(params["se2_w"])
    se_b2 = pack_bias(params["se2_b"])
    gain_alpha = params["skipinit_gain"][0] * alpha                    # traced scalar -> SMEM

    sc_conv = (stride != 1) or (in_planes != planes)
    if sc_conv:
        sc_w_t = pack_conv_weight_matmul(ws_standardize(params["sc_w"], params["sc_gain"]))
        sc_b = pack_bias(params["sc_b"])
        sc_sp = a_b[:, ::stride, ::stride, :]                          # (N, Ho, Wo, c_in) bf16
        c_sc, sc_isz = c_in, 2
    else:
        sc_w_t = sc_b = None
        sc_sp = x                                                      # identity path, f32
        c_sc, sc_isz = planes, 4

    # Constant-index blocks are double-buffered by Pallas: count them 2x in `fixed`.
    fixed = 2 * ((9 * planes * planes + 2 * planes * planes) * 2 + 4 * planes * 4)
    if sc_conv:
        fixed += 2 * (c_in * planes * 2 + planes * 4)
    th, n_tiles = _pick_tail_rows(n, ho, wo_r, planes, planes, c_sc, sc_isz, fixed, budget)
    hp = n_tiles * th

    # Halo-replicated row tiles of relu(out1): spatial zero-pad (conv padding=1 plus
    # tile/width alignment), then gather overlapping (th+2)-row windows.
    out1_pad = jnp.pad(out1_act, ((0, 0), (1, 1 + hp - ho), (1, 1 + wo_r - wo), (0, 0)))
    row_idx = jnp.arange(n_tiles)[:, None] * th + jnp.arange(th + 2)[None, :]
    x1_halo = out1_pad[:, row_idx].reshape(n * n_tiles, th + 2, wo_r + 2, planes)

    # Shortcut rows, aligned to the same (tile, row, col) flattening as the output.
    sc_sp = jnp.pad(sc_sp, ((0, 0), (0, hp - ho), (0, wo_r - wo), (0, 0)))
    sc_rows = sc_sp.reshape(n * n_tiles, th * wo_r, c_sc)

    out = fused_tail(x1_halo, sc_rows, w2_taps, b2, se_w1_t, se_b1, se_w2_t, se_b2,
                     gain_alpha, th, wo_r, sc_w_t=sc_w_t, sc_b_row=sc_b,
                     vmem_limit=limit)                                 # (G, th*wo_r, planes) f32

    out = out.reshape(n, hp, wo_r, planes)[:, :ho, :wo, :]
    if output_nchw:
        out = jnp.transpose(out, (0, 3, 1, 2))                         # PyTorch NCHW
    return out


if __name__ == "__main__":
    key = jax.random.PRNGKey(0)
    kx, kp = jax.random.split(key)

    in_planes, planes, stride = 4, 8, 1      # in_planes != planes -> fused shortcut conv path
    x = jax.random.normal(kx, (2, in_planes, 16, 16), dtype=jnp.float32)
    params = init_block_params(kp, in_planes, planes)

    fwd = jax.jit(functools.partial(nf_basic_block_forward,
                                    in_planes=in_planes, planes=planes,
                                    stride=stride, beta=1.0, alpha=1.0))
    out = fwd(x, params)
    jax.block_until_ready(out)
    assert out.shape == (2, planes, 16, 16)
    assert bool(jnp.all(jnp.isfinite(out)))
    print("KERNEL_OK")
</pallas_src>

<mosaic_0001>
module attributes {stable_mosaic.version = 11 : i64} {
  func.func @_conv_bias_relu_kernel(%arg0: i32, %arg1: memref<128x36xbf16, #tpu.memory_space<vmem>>, %arg2: memref<36x8xbf16, #tpu.memory_space<vmem>>, %arg3: memref<1x8xf32, #tpu.memory_space<vmem>>, %arg4: memref<128x8xbf16, #tpu.memory_space<vmem>>) attributes {dimension_semantics = [#tpu.dimension_semantics<parallel>], iteration_bounds = array<i64: 4>, scalar_prefetch = 0 : i64, scratch_operands = 0 : i64, tpu.core_type = #tpu.core_type<tc>, window_params = [{transform_indices = @transform_0, window_bounds = array<i64: 128, 36>}, {pipeline_mode = #tpu.pipeline_mode<synchronous>, transform_indices = @transform_1, window_bounds = array<i64: 36, 8>}, {pipeline_mode = #tpu.pipeline_mode<synchronous>, transform_indices = @transform_2, window_bounds = array<i64: 1, 8>}, {transform_indices = @transform_3, window_bounds = array<i64: 128, 8>}]} {
    %c0 = arith.constant 0 : index
    %c0_0 = arith.constant 0 : index
    %0 = vector.load %arg1[%c0, %c0_0] : memref<128x36xbf16, #tpu.memory_space<vmem>>, vector<128x36xbf16>
    %c0_1 = arith.constant 0 : index
    %c0_2 = arith.constant 0 : index
    %1 = vector.load %arg2[%c0_1, %c0_2] : memref<36x8xbf16, #tpu.memory_space<vmem>>, vector<36x8xbf16>
    %cst = arith.constant dense<0.000000e+00> : vector<128x8xf32>
    %2 = tpu.matmul %0, %1, %cst {dimension_numbers = #tpu.dot_dimension_numbers<[1], [0], [0], [1], [0, 0, 1, 1], [], []>} : vector<128x36xbf16>, vector<36x8xbf16>, vector<128x8xf32> -> vector<128x8xf32>
    %c0_3 = arith.constant 0 : index
    %c0_4 = arith.constant 0 : index
    %3 = vector.load %arg3[%c0_3, %c0_4] : memref<1x8xf32, #tpu.memory_space<vmem>>, vector<1x8xf32>
    %4 = vector.broadcast %3 : vector<1x8xf32> to vector<128x8xf32>
    %5 = arith.addf %2, %4 : vector<128x8xf32>
    %cst_5 = arith.constant 0.000000e+00 : f32
    %6 = vector.broadcast %cst_5 : f32 to vector<128x8xf32>
    %7 = arith.maximumf %5, %6 : vector<128x8xf32>
    %8 = arith.truncf %7 : vector<128x8xf32> to vector<128x8xbf16>
    %c0_6 = arith.constant 0 : index
    %c0_7 = arith.constant 0 : index
    %9 = vector.load %arg4[%c0_6, %c0_7] : memref<128x8xbf16, #tpu.memory_space<vmem>>, vector<128x8xbf16>
    tpu.vector_store %arg4[%c0_6, %c0_7], %8 {strides = array<i32>} : memref<128x8xbf16, #tpu.memory_space<vmem>>, vector<128x8xbf16>,
    return
  }
  func.func @transform_0(%arg0: i32) -> (i32, i32) {
    %c0_i32 = arith.constant 0 : i32
    %c0_i32_0 = arith.constant 0 : i32
    return %arg0, %c0_i32 : i32, i32
  }
  func.func @transform_1(%arg0: i32) -> (i32, i32) {
    %c0_i32 = arith.constant 0 : i32
    %c0_i32_0 = arith.constant 0 : i32
    %c0_i32_1 = arith.constant 0 : i32
    return %c0_i32, %c0_i32_0 : i32, i32
  }
  func.func @transform_2(%arg0: i32) -> (i32, i32) {
    %c0_i32 = arith.constant 0 : i32
    %c0_i32_0 = arith.constant 0 : i32
    %c0_i32_1 = arith.constant 0 : i32
    return %c0_i32, %c0_i32_0 : i32, i32
  }
  func.func @transform_3(%arg0: i32) -> (i32, i32) {
    %c0_i32 = arith.constant 0 : i32
    %c0_i32_0 = arith.constant 0 : i32
    return %arg0, %c0_i32 : i32, i32
  }
}

module attributes {stable_mosaic.version = 11 : i64} {
  func.func @_fused_tail_kernel(%arg0: i32, %arg1: memref<1x10x18x8xbf16, #tpu.memory_space<vmem>>, %arg2: memref<9x8x8xbf16, #tpu.memory_space<vmem>>, %arg3: memref<1x8xf32, #tpu.memory_space<vmem>>, %arg4: memref<8x8xbf16, #tpu.memory_space<vmem>>, %arg5: memref<1x8xf32, #tpu.memory_space<vmem>>, %arg6: memref<8x8xbf16, #tpu.memory_space<vmem>>, %arg7: memref<1x8xf32, #tpu.memory_space<vmem>>, %arg8: memref<1x128x4xbf16, #tpu.memory_space<vmem>>, %arg9: memref<4x8xbf16, #tpu.memory_space<vmem>>, %arg10: memref<1x8xf32, #tpu.memory_space<vmem>>, %arg11: memref<1x1xf32, #tpu.memory_space<smem>>, %arg12: memref<1x128x8xf32, #tpu.memory_space<vmem>>) attributes {dimension_semantics = [#tpu.dimension_semantics<parallel>], iteration_bounds = array<i64: 4>, scalar_prefetch = 0 : i64, scratch_operands = 0 : i64, tpu.core_type = #tpu.core_type<tc>, window_params = [{transform_indices = @transform_0, window_bounds = array<i64: 1, 10, 18, 8>}, {pipeline_mode = #tpu.pipeline_mode<synchronous>, transform_indices = @transform_1, window_bounds = array<i64: 9, 8, 8>}, {pipeline_mode = #tpu.pipeline_mode<synchronous>, transform_indices = @transform_2, window_bounds = array<i64: 1, 8>}, {pipeline_mode = #tpu.pipeline_mode<synchronous>, transform_indices = @transform_3, window_bounds = array<i64: 8, 8>}, {pipeline_mode = #tpu.pipeline_mode<synchronous>, transform_indices = @transform_4, window_bounds = array<i64: 1, 8>}, {pipeline_mode = #tpu.pipeline_mode<synchronous>, transform_indices = @transform_5, window_bounds = array<i64: 8, 8>}, {pipeline_mode = #tpu.pipeline_mode<synchronous>, transform_indices = @transform_6, window_bounds = array<i64: 1, 8>}, {transform_indices = @transform_7, window_bounds = array<i64: 1, 128, 4>}, {pipeline_mode = #tpu.pipeline_mode<synchronous>, transform_indices = @transform_8, window_bounds = array<i64: 4, 8>}, {pipeline_mode = #tpu.pipeline_mode<synchronous>, transform_indices = @transform_9, window_bounds = array<i64: 1, 8>}, {transform_indices = @transform_10, window_bounds = array<i64: 1, 1>}, {transform_indices = @transform_11, window_bounds = array<i64: 1, 128, 8>}]} {
    %c0 = arith.constant 0 : index
    %c0_0 = arith.constant 0 : index
    %c0_1 = arith.constant 0 : index
    %c0_2 = arith.constant 0 : index
    %0 = vector.load %arg1[%c0, %c0_0, %c0_1, %c0_2] : memref<1x10x18x8xbf16, #tpu.memory_space<vmem>>, vector<1x10x18x8xbf16>
    %1 = vector.shape_cast %0 : vector<1x10x18x8xbf16> to vector<10x18x8xbf16>
    %2 = arith.extf %1 : vector<10x18x8xbf16> to vector<10x18x8xf32>
    %cst = arith.constant 0.000000e+00 : f32
    %3 = vector.broadcast %cst : f32 to vector<128x8xf32>
    %4 = vector.extract_strided_slice %2 {offsets = [0, 0, 0], sizes = [8, 16, 8], strides = [1, 1, 1]} : vector<10x18x8xf32> to vector<8x16x8xf32>
    %5 = vector.shape_cast %4 : vector<8x16x8xf32> to vector<128x8xf32>
    %6 = arith.truncf %5 : vector<128x8xf32> to vector<128x8xbf16>
    %c0_3 = arith.constant 0 : index
    %c0_4 = arith.constant 0 : index
    %c0_5 = arith.constant 0 : index
    %7 = vector.load %arg2[%c0_3, %c0_4, %c0_5] : memref<9x8x8xbf16, #tpu.memory_space<vmem>>, vector<1x8x8xbf16>
    %8 = vector.shape_cast %7 : vector<1x8x8xbf16> to vector<8x8xbf16>
    %cst_6 = arith.constant dense<0.000000e+00> : vector<128x8xf32>
    %9 = tpu.matmul %6, %8, %cst_6 {dimension_numbers = #tpu.dot_dimension_numbers<[1], [0], [0], [1], [0, 0, 1, 1], [], []>} : vector<128x8xbf16>, vector<8x8xbf16>, vector<128x8xf32> -> vector<128x8xf32>
    %10 = arith.addf %3, %9 : vector<128x8xf32>
    %11 = vector.extract_strided_slice %2 {offsets = [0, 1, 0], sizes = [8, 16, 8], strides = [1, 1, 1]} : vector<10x18x8xf32> to vector<8x16x8xf32>
    %12 = vector.shape_cast %11 : vector<8x16x8xf32> to vector<128x8xf32>
    %13 = arith.truncf %12 : vector<128x8xf32> to vector<128x8xbf16>
    %c1 = arith.constant 1 : index
    %c0_7 = arith.constant 0 : index
    %c0_8 = arith.constant 0 : index
    %14 = vector.load %arg2[%c1, %c0_7, %c0_8] : memref<9x8x8xbf16, #tpu.memory_space<vmem>>, vector<1x8x8xbf16>
    %15 = vector.shape_cast %14 : vector<1x8x8xbf16> to vector<8x8xbf16>
    %cst_9 = arith.constant dense<0.000000e+00> : vector<128x8xf32>
    %16 = tpu.matmul %13, %15, %cst_9 {dimension_numbers = #tpu.dot_dimension_numbers<[1], [0], [0], [1], [0, 0, 1, 1], [], []>} : vector<128x8xbf16>, vector<8x8xbf16>, vector<128x8xf32> -> vector<128x8xf32>
    %17 = arith.addf %10, %16 : vector<128x8xf32>
    %18 = vector.extract_strided_slice %2 {offsets = [0, 2, 0], sizes = [8, 16, 8], strides = [1, 1, 1]} : vector<10x18x8xf32> to vector<8x16x8xf32>
    %19 = vector.shape_cast %18 : vector<8x16x8xf32> to vector<128x8xf32>
    %20 = arith.truncf %19 : vector<128x8xf32> to vector<128x8xbf16>
    %c2 = arith.constant 2 : index
    %c0_10 = arith.constant 0 : index
    %c0_11 = arith.constant 0 : index
    %21 = vector.load %arg2[%c2, %c0_10, %c0_11] : memref<9x8x8xbf16, #tpu.memory_space<vmem>>, vector<1x8x8xbf16>
    %22 = vector.shape_cast %21 : vector<1x8x8xbf16> to vector<8x8xbf16>
    %cst_12 = arith.constant dense<0.000000e+00> : vector<128x8xf32>
    %23 = tpu.matmul %20, %22, %cst_12 {dimension_numbers = #tpu.dot_dimension_numbers<[1], [0], [0], [1], [0, 0, 1, 1], [], []>} : vector<128x8xbf16>, vector<8x8xbf16>, vector<128x8xf32> -> vector<128x8xf32>
    %24 = arith.addf %17, %23 : vector<128x8xf32>
    %25 = vector.extract_strided_slice %2 {offsets = [1, 0, 0], sizes = [8, 16, 8], strides = [1, 1, 1]} : vector<10x18x8xf32> to vector<8x16x8xf32>
    %26 = vector.shape_cast %25 : vector<8x16x8xf32> to vector<128x8xf32>
    %27 = arith.truncf %26 : vector<128x8xf32> to vector<128x8xbf16>
    %c3 = arith.constant 3 : index
    %c0_13 = arith.constant 0 : index
    %c0_14 = arith.constant 0 : index
    %28 = vector.load %arg2[%c3, %c0_13, %c0_14] : memref<9x8x8xbf16, #tpu.memory_space<vmem>>, vector<1x8x8xbf16>
    %29 = vector.shape_cast %28 : vector<1x8x8xbf16> to vector<8x8xbf16>
    %cst_15 = arith.constant dense<0.000000e+00> : vector<128x8xf32>
    %30 = tpu.matmul %27, %29, %cst_15 {dimension_numbers = #tpu.dot_dimension_numbers<[1], [0], [0], [1], [0, 0, 1, 1], [], []>} : vector<128x8xbf16>, vector<8x8xbf16>, vector<128x8xf32> -> vector<128x8xf32>
    %31 = arith.addf %24, %30 : vector<128x8xf32>
    %32 = vector.extract_strided_slice %2 {offsets = [1, 1, 0], sizes = [8, 16, 8], strides = [1, 1, 1]} : vector<10x18x8xf32> to vector<8x16x8xf32>
    %33 = vector.shape_cast %32 : vector<8x16x8xf32> to vector<128x8xf32>
    %34 = arith.truncf %33 : vector<128x8xf32> to vector<128x8xbf16>
    %c4 = arith.constant 4 : index
    %c0_16 = arith.constant 0 : index
    %c0_17 = arith.constant 0 : index
    %35 = vector.load %arg2[%c4, %c0_16, %c0_17] : memref<9x8x8xbf16, #tpu.memory_space<vmem>>, vector<1x8x8xbf16>
    %36 = vector.shape_cast %35 : vector<1x8x8xbf16> to vector<8x8xbf16>
    %cst_18 = arith.constant dense<0.000000e+00> : vector<128x8xf32>
    %37 = tpu.matmul %34, %36, %cst_18 {dimension_numbers = #tpu.dot_dimension_numbers<[1], [0], [0], [1], [0, 0, 1, 1], [], []>} : vector<128x8xbf16>, vector<8x8xbf16>, vector<128x8xf32> -> vector<128x8xf32>
    %38 = arith.addf %31, %37 : vector<128x8xf32>
    %39 = vector.extract_strided_slice %2 {offsets = [1, 2, 0], sizes = [8, 16, 8], strides = [1, 1, 1]} : vector<10x18x8xf32> to vector<8x16x8xf32>
    %40 = vector.shape_cast %39 : vector<8x16x8xf32> to vector<128x8xf32>
    %41 = arith.truncf %40 : vector<128x8xf32> to vector<128x8xbf16>
    %c5 = arith.constant 5 : index
    %c0_19 = arith.constant 0 : index
    %c0_20 = arith.constant 0 : index
    %42 = vector.load %arg2[%c5, %c0_19, %c0_20] : memref<9x8x8xbf16, #tpu.memory_space<vmem>>, vector<1x8x8xbf16>
    %43 = vector.shape_cast %42 : vector<1x8x8xbf16> to vector<8x8xbf16>
    %cst_21 = arith.constant dense<0.000000e+00> : vector<128x8xf32>
    %44 = tpu.matmul %41, %43, %cst_21 {dimension_numbers = #tpu.dot_dimension_numbers<[1], [0], [0], [1], [0, 0, 1, 1], [], []>} : vector<128x8xbf16>, vector<8x8xbf16>, vector<128x8xf32> -> vector<128x8xf32>
    %45 = arith.addf %38, %44 : vector<128x8xf32>
    %46 = vector.extract_strided_slice %2 {offsets = [2, 0, 0], sizes = [8, 16, 8], strides = [1, 1, 1]} : vector<10x18x8xf32> to vector<8x16x8xf32>
    %47 = vector.shape_cast %46 : vector<8x16x8xf32> to vector<128x8xf32>
    %48 = arith.truncf %47 : vector<128x8xf32> to vector<128x8xbf16>
    %c6 = arith.constant 6 : index
    %c0_22 = arith.constant 0 : index
    %c0_23 = arith.constant 0 : index
    %49 = vector.load %arg2[%c6, %c0_22, %c0_23] : memref<9x8x8xbf16, #tpu.memory_space<vmem>>, vector<1x8x8xbf16>
    %50 = vector.shape_cast %49 : vector<1x8x8xbf16> to vector<8x8xbf16>
    %cst_24 = arith.constant dense<0.000000e+00> : vector<128x8xf32>
    %51 = tpu.matmul %48, %50, %cst_24 {dimension_numbers = #tpu.dot_dimension_numbers<[1], [0], [0], [1], [0, 0, 1, 1], [], []>} : vector<128x8xbf16>, vector<8x8xbf16>, vector<128x8xf32> -> vector<128x8xf32>
    %52 = arith.addf %45, %51 : vector<128x8xf32>
    %53 = vector.extract_strided_slice %2 {offsets = [2, 1, 0], sizes = [8, 16, 8], strides = [1, 1, 1]} : vector<10x18x8xf32> to vector<8x16x8xf32>
    %54 = vector.shape_cast %53 : vector<8x16x8xf32> to vector<128x8xf32>
    %55 = arith.truncf %54 : vector<128x8xf32> to vector<128x8xbf16>
    %c7 = arith.constant 7 : index
    %c0_25 = arith.constant 0 : index
    %c0_26 = arith.constant 0 : index
    %56 = vector.load %arg2[%c7, %c0_25, %c0_26] : memref<9x8x8xbf16, #tpu.memory_space<vmem>>, vector<1x8x8xbf16>
    %57 = vector.shape_cast %56 : vector<1x8x8xbf16> to vector<8x8xbf16>
    %cst_27 = arith.constant dense<0.000000e+00> : vector<128x8xf32>
    %58 = tpu.matmul %55, %57, %cst_27 {dimension_numbers = #tpu.dot_dimension_numbers<[1], [0], [0], [1], [0, 0, 1, 1], [], []>} : vector<128x8xbf16>, vector<8x8xbf16>, vector<128x8xf32> -> vector<128x8xf32>
    %59 = arith.addf %52, %58 : vector<128x8xf32>
    %60 = vector.extract_strided_slice %2 {offsets = [2, 2, 0], sizes = [8, 16, 8], strides = [1, 1, 1]} : vector<10x18x8xf32> to vector<8x16x8xf32>
    %61 = vector.shape_cast %60 : vector<8x16x8xf32> to vector<128x8xf32>
    %62 = arith.truncf %61 : vector<128x8xf32> to vector<128x8xbf16>
    %c8 = arith.constant 8 : index
    %c0_28 = arith.constant 0 : index
    %c0_29 = arith.constant 0 : index
    %63 = vector.load %arg2[%c8, %c0_28, %c0_29] : memref<9x8x8xbf16, #tpu.memory_space<vmem>>, vector<1x8x8xbf16>
    %64 = vector.shape_cast %63 : vector<1x8x8xbf16> to vector<8x8xbf16>
    %cst_30 = arith.constant dense<0.000000e+00> : vector<128x8xf32>
    %65 = tpu.matmul %62, %64, %cst_30 {dimension_numbers = #tpu.dot_dimension_numbers<[1], [0], [0], [1], [0, 0, 1, 1], [], []>} : vector<128x8xbf16>, vector<8x8xbf16>, vector<128x8xf32> -> vector<128x8xf32>
    %66 = arith.addf %59, %65 : vector<128x8xf32>
    %c0_31 = arith.constant 0 : index
    %c0_32 = arith.constant 0 : index
    %67 = vector.load %arg3[%c0_31, %c0_32] : memref<1x8xf32, #tpu.memory_space<vmem>>, vector<1x8xf32>
    %68 = vector.broadcast %67 : vector<1x8xf32> to vector<128x8xf32>
    %69 = arith.addf %66, %68 : vector<128x8xf32>
    %c0_33 = arith.constant 0 : index
    %c0_34 = arith.constant 0 : index
    %c0_35 = arith.constant 0 : index
    %70 = vector.load %arg8[%c0_33, %c0_34, %c0_35] : memref<1x128x4xbf16, #tpu.memory_space<vmem>>, vector<1x128x4xbf16>
    %71 = vector.shape_cast %70 : vector<1x128x4xbf16> to vector<128x4xbf16>
    %c0_36 = arith.constant 0 : index
    %c0_37 = arith.constant 0 : index
    %72 = vector.load %arg9[%c0_36, %c0_37] : memref<4x8xbf16, #tpu.memory_space<vmem>>, vector<4x8xbf16>
    %cst_38 = arith.constant dense<0.000000e+00> : vector<128x8xf32>
    %73 = tpu.matmul %71, %72, %cst_38 {dimension_numbers = #tpu.dot_dimension_numbers<[1], [0], [0], [1], [0, 0, 1, 1], [], []>} : vector<128x4xbf16>, vector<4x8xbf16>, vector<128x8xf32> -> vector<128x8xf32>
    %c0_39 = arith.constant 0 : index
    %c0_40 = arith.constant 0 : index
    %74 = vector.load %arg10[%c0_39, %c0_40] : memref<1x8xf32, #tpu.memory_space<vmem>>, vector<1x8xf32>
    %75 = vector.broadcast %74 : vector<1x8xf32> to vector<128x8xf32>
    %76 = arith.addf %73, %75 : vector<128x8xf32>
    %77 = arith.truncf %69 : vector<128x8xf32> to vector<128x8xbf16>
    %c0_41 = arith.constant 0 : index
    %c0_42 = arith.constant 0 : index
    %78 = vector.load %arg4[%c0_41, %c0_42] : memref<8x8xbf16, #tpu.memory_space<vmem>>, vector<8x8xbf16>
    %cst_43 = arith.constant dense<0.000000e+00> : vector<128x8xf32>
    %79 = tpu.matmul %77, %78, %cst_43 {dimension_numbers = #tpu.dot_dimension_numbers<[1], [0], [0], [1], [0, 0, 1, 1], [], []>} : vector<128x8xbf16>, vector<8x8xbf16>, vector<128x8xf32> -> vector<128x8xf32>
    %c0_44 = arith.constant 0 : index
    %c0_45 = arith.constant 0 : index
    %80 = vector.load %arg5[%c0_44, %c0_45] : memref<1x8xf32, #tpu.memory_space<vmem>>, vector<1x8xf32>
    %81 = vector.broadcast %80 : vector<1x8xf32> to vector<128x8xf32>
    %82 = arith.addf %79, %81 : vector<128x8xf32>
    %cst_46 = arith.constant 0.000000e+00 : f32
    %83 = vector.broadcast %cst_46 : f32 to vector<128x8xf32>
    %84 = arith.maximumf %82, %83 : vector<128x8xf32>
    %85 = arith.truncf %84 : vector<128x8xf32> to vector<128x8xbf16>
    %c0_47 = arith.constant 0 : index
    %c0_48 = arith.constant 0 : index
    %86 = vector.load %arg6[%c0_47, %c0_48] : memref<8x8xbf16, #tpu.memory_space<vmem>>, vector<8x8xbf16>
    %cst_49 = arith.constant dense<0.000000e+00> : vector<128x8xf32>
    %87 = tpu.matmul %85, %86, %cst_49 {dimension_numbers = #tpu.dot_dimension_numbers<[1], [0], [0], [1], [0, 0, 1, 1], [], []>} : vector<128x8xbf16>, vector<8x8xbf16>, vector<128x8xf32> -> vector<128x8xf32>
    %c0_50 = arith.constant 0 : index
    %c0_51 = arith.constant 0 : index
    %88 = vector.load %arg7[%c0_50, %c0_51] : memref<1x8xf32, #tpu.memory_space<vmem>>, vector<1x8xf32>
    %89 = vector.broadcast %88 : vector<1x8xf32> to vector<128x8xf32>
    %90 = arith.addf %87, %89 : vector<128x8xf32>
    %91 = arith.negf %90 : vector<128x8xf32>
    %92 = math.exp %91 : vector<128x8xf32>
    %cst_52 = arith.constant 1.000000e+00 : f32
    %93 = vector.broadcast %cst_52 : f32 to vector<128x8xf32>
    %94 = arith.addf %93, %92 : vector<128x8xf32>
    %95 = arith.divf %93, %94 : vector<128x8xf32>
    %cst_53 = arith.constant 2.000000e+00 : f32
    %96 = vector.broadcast %cst_53 : f32 to vector<128x8xf32>
    %97 = arith.mulf %95, %96 : vector<128x8xf32>
    %98 = arith.mulf %97, %69 : vector<128x8xf32>
    %c0_54 = arith.constant 0 : index
    %c0_55 = arith.constant 0 : index
    %99 = memref.load %arg11[%c0_54, %c0_55] : memref<1x1xf32, #tpu.memory_space<smem>>
    %100 = vector.broadcast %99 : f32 to vector<128x8xf32>
    %101 = arith.mulf %98, %100 : vector<128x8xf32>
    %102 = arith.addf %101, %76 : vector<128x8xf32>
    %c0_56 = arith.constant 0 : index
    %c0_57 = arith.constant 0 : index
    %c0_58 = arith.constant 0 : index
    %103 = vector.load %arg12[%c0_56, %c0_57, %c0_58] : memref<1x128x8xf32, #tpu.memory_space<vmem>>, vector<1x128x8xf32>
    %104 = vector.shape_cast %103 : vector<1x128x8xf32> to vector<128x8xf32>
    %105 = vector.shape_cast %102 : vector<128x8xf32> to vector<1x128x8xf32>
    tpu.vector_store %arg12[%c0_56, %c0_57, %c0_58], %105 {strides = array<i32>} : memref<1x128x8xf32, #tpu.memory_space<vmem>>, vector<1x128x8xf32>,
    return
  }
  func.func @transform_0(%arg0: i32) -> (i32, i32, i32, i32) {
    %c0_i32 = arith.constant 0 : i32
    %c0_i32_0 = arith.constant 0 : i32
    %c0_i32_1 = arith.constant 0 : i32
    %c0_i32_2 = arith.constant 0 : i32
    return %arg0, %c0_i32, %c0_i32_0, %c0_i32_1 : i32, i32, i32, i32
  }
  func.func @transform_1(%arg0: i32) -> (i32, i32, i32) {
    %c0_i32 = arith.constant 0 : i32
    %c0_i32_0 = arith.constant 0 : i32
    %c0_i32_1 = arith.constant 0 : i32
    %c0_i32_2 = arith.constant 0 : i32
    return %c0_i32, %c0_i32_0, %c0_i32_1 : i32, i32, i32
  }
  func.func @transform_2(%arg0: i32) -> (i32, i32) {
    %c0_i32 = arith.constant 0 : i32
    %c0_i32_0 = arith.constant 0 : i32
    %c0_i32_1 = arith.constant 0 : i32
    return %c0_i32, %c0_i32_0 : i32, i32
  }
  func.func @transform_3(%arg0: i32) -> (i32, i32) {
    %c0_i32 = arith.constant 0 : i32
    %c0_i32_0 = arith.constant 0 : i32
    %c0_i32_1 = arith.constant 0 : i32
    return %c0_i32, %c0_i32_0 : i32, i32
  }
  func.func @transform_4(%arg0: i32) -> (i32, i32) {
    %c0_i32 = arith.constant 0 : i32
    %c0_i32_0 = arith.constant 0 : i32
    %c0_i32_1 = arith.constant 0 : i32
    return %c0_i32, %c0_i32_0 : i32, i32
  }
  func.func @transform_5(%arg0: i32) -> (i32, i32) {
    %c0_i32 = arith.constant 0 : i32
    %c0_i32_0 = arith.constant 0 : i32
    %c0_i32_1 = arith.constant 0 : i32
    return %c0_i32, %c0_i32_0 : i32, i32
  }
  func.func @transform_6(%arg0: i32) -> (i32, i32) {
    %c0_i32 = arith.constant 0 : i32
    %c0_i32_0 = arith.constant 0 : i32
    %c0_i32_1 = arith.constant 0 : i32
    return %c0_i32, %c0_i32_0 : i32, i32
  }
  func.func @transform_7(%arg0: i32) -> (i32, i32, i32) {
    %c0_i32 = arith.constant 0 : i32
    %c0_i32_0 = arith.constant 0 : i32
    %c0_i32_1 = arith.constant 0 : i32
    return %arg0, %c0_i32, %c0_i32_0 : i32, i32, i32
  }
  func.func @transform_8(%arg0: i32) -> (i32, i32) {
    %c0_i32 = arith.constant 0 : i32
    %c0_i32_0 = arith.constant 0 : i32
    %c0_i32_1 = arith.constant 0 : i32
    return %c0_i32, %c0_i32_0 : i32, i32
  }
  func.func @transform_9(%arg0: i32) -> (i32, i32) {
    %c0_i32 = arith.constant 0 : i32
    %c0_i32_0 = arith.constant 0 : i32
    %c0_i32_1 = arith.constant 0 : i32
    return %c0_i32, %c0_i32_0 : i32, i32
  }
  func.func @transform_10(%arg0: i32) -> (i32, i32) {
    %c0_i32 = arith.constant 0 : i32
    %c0_i32_0 = arith.constant 0 : i32
    %c0_i32_1 = arith.constant 0 : i32
    return %c0_i32, %c0_i32_0 : i32, i32
  }
  func.func @transform_11(%arg0: i32) -> (i32, i32, i32) {
    %c0_i32 = arith.constant 0 : i32
    %c0_i32_0 = arith.constant 0 : i32
    %c0_i32_1 = arith.constant 0 : i32
    return %arg0, %c0_i32, %c0_i32_0 : i32, i32, i32
  }
}

</mosaic_0001>

<bundles_post_ra>
// kernel: nf_basic_block_forward.2
= control target key start
LH: loop header
LB: loop body
LE: loop exit
PB: predicated region body
PF: predicated region fallthrough
CT: control target
= control target key end

     0   :  { %s688_s12 = smov 0   ;;  %s784_s0 = inlined_call_operand.vmem [shape: bf16[512,36], index: 0, kind: input, shape index: {}]   ;;  %s785_s1 = inlined_call_operand.vmem [shape: bf16[36,8], index: 1, kind: input, shape index: {}]   ;;  %s786_s2 = inlined_call_operand.vmem [shape: f32[1,8], index: 2, kind: input, shape index: {}]   ;;  %s787_s3 = inlined_call_operand.vmem [shape: bf16[512,8], index: 3, kind: output, shape index: {}]  }
   0x1 LB: > { %s537_s13 = sadd.s32 4294967295, %s666_s12   ;;  %p541_p0 = scmp.ge.s32.totalorder %s666_s12, 1  ;;  %s666_s12 = sphi %s688_s12, %s13_s12  }
   0x2   : > { %p138_p1 = scmp.lt.s32.totalorder %s666_s12, 5 }
   0x4   : > { %p139_p2 = pnand %p541_p0, %p138_p1 }
   0x5   : > { %s542_s18 = sshll.u32 (!%p139_p2), %s537_s13, 4 }
   0x6   : > { %142 = sbr.rel (%p139_p2) target bundleno = 238 (0xee), region = 32  ;;  %p163_p3 = scmp.lt.s32.totalorder (!%p139_p2), %s542_s18, 63 }
   0xb   : > { %v649_v0 = vld [vmem:[%s785_s1 + $0x10] ss:$0 sps:$4 sm:$0x33]   ;;  %vm283_vm0 = vcmask 1041408   ;;  %v650_v1 = vld [vmem:[%s785_s1 + $0x8] sm:$0xff]   ;;  %v651_v3 = vld [vmem:[%s785_s1] sm:$0xff]  }
   0xc   : > { %639 = vmatprep.subr.msk.bf16.mxu0 %vm283_vm0, %v649_v0  ;;  %640 = vmatprep.subr.msk.bf16.mxu1 %vm283_vm0, %v649_v0  ;;  %v285_v2 = vsel %vm283_vm0, %v649_v0, 0  ;;  %s789_s18 = smov (!%p163_p3, %s542_s18), 63  ;;  %vm258_vm1 = vcmask 293888   ;;  %v724_v12 = vld [vmem:[%s786_s2] ss:$0 sm:$0xff]  ;;  %vm464_vm2 = vcmask 60416  }
   0xd   : > { %612 = vmatpush3.bf16.msra.mxu0 %v285_v2  ;;  %636 = vmatpush3.bf16.msra.mxu1 %v285_v2  ;;  %s543_s21 = sshll.u32 %s789_s18, 2 }
   0xe   : > { %613 = vmatprep.subr.bf16.mxu0 %v650_v1  ;;  %634 = vmatprep.subr.bf16.mxu1 %v650_v1  ;;  %s166_s24 = scalar_lea.vmem %s784_s0, %s543_s21  ;;  %s735_s29 = scalar_lea.vmem %s787_s3, %s543_s21 }
   0xf   : > { %v652_v4 = vld [vmem:[%s166_s24] sm:$0xff]   ;;  %v654_v6 = vld [vmem:[%s166_s24 + $0x8] sm:$0xff]   ;;  %v656_v8 = vld [vmem:[%s166_s24 + $0x10] sm:$0xff]  }
  0x10   : > { %v653_v5 = vld [vmem:[%s166_s24 + $0x20] sm:$0xff]   ;;  %617 = vmatprep.mubr.msk.bf16.mxu0 %vm258_vm1, %v652_v4  ;;  %v655_v7 = vld [vmem:[%s166_s24 + $0x28] sm:$0xff]   ;;  %v657_v9 = vld [vmem:[%s166_s24 + $0x30] sm:$0xff]  }
  0x11   : > { %614 = vmatpush3.bf16.msra.mxu0 %v650_v1  ;;  %637 = vmatpush3.bf16.msra.mxu1 %v650_v1  ;;  %v658_v10 = vld [vmem:[%s166_s24 + $0x18] sm:$0xff]  }
  0x12   : > { %615 = vmatprep.subr.bf16.mxu0 %v651_v3  ;;  %635 = vmatprep.subr.bf16.mxu1 %v651_v3  ;;  %v659_v11 = vld [vmem:[%s166_s24 + $0x38] sm:$0xff]  }
  0x13   : > { %625 = vmatprep.mubr.msk.bf16.mxu1 %vm258_vm1, %v653_v5 }
  0x15   : > { %616 = vmatpush3.bf16.msra.mxu0 %v651_v3  ;;  %638 = vmatpush3.bf16.msra.mxu1 %v651_v3 }
  0x18   : > { %618 = vmatmul.mubr.msk.bf16.vlgmr.msra.gmra.mxu0 %vm258_vm1, %v654_v6  ;;  %626 = vmatmul.mubr.msk.bf16.vlgmr.msra.gmra.mxu1 %vm258_vm1, %v655_v7 }
  0x19   : > { %621 = vmatprep.mubr.msk.bf16.mxu0 %vm258_vm1, %v656_v8  ;;  %629 = vmatprep.mubr.msk.bf16.mxu1 %vm258_vm1, %v657_v9 }
  0x20   : > { %622 = vmatmul.mubr.msk.bf16.gmra.mxu0 %vm258_vm1, %v658_v10  ;;  %630 = vmatmul.mubr.msk.bf16.gmra.mxu1 %vm258_vm1, %v659_v11 }
  0xd8   : > { %v619_v13 = vpop.f32.mrf.mxu0  ;;  %v627_v14 = vpop.f32.mrf.mxu1 }
  0xd9   : > { %v330_v15 = vadd.f32 %v619_v13, %v724_v12  ;;  %v362_v16 = vadd.f32 %v627_v14, %v724_v12 }
  0xda   : > { %v321_v17 = vpop.f32.mrf.mxu0  ;;  %v353_v18 = vpop.f32.mrf.mxu1 }
  0xdb   : > { %v386_v19 = vmax.f32 %v330_v15, 0.0  ;;  %v394_v20 = vmax.f32 %v362_v16, 0.0  ;;  %v322_v21 = vadd.f32 %v724_v12, %v321_v17  ;;  %v354_v22 = vadd.f32 %v724_v12, %v353_v18 }
  0xdc   : > { %v620_v23 = vpop.f32.mrf.mxu0  ;;  %v628_v24 = vpop.f32.mrf.mxu1 }
  0xdd   : > { %v586_v25 = vpack.c.bf16 %v386_v19, %v386_v19  ;;  %v594_v26 = vpack.c.bf16 %v394_v20, %v394_v20  ;;  %v384_v27 = vmax.f32 %v322_v21, 0.0  ;;  %v392_v28 = vmax.f32 %v354_v22, 0.0 }
  0xde   : > { %v333_v29 = vadd.f32 %v620_v23, %v724_v12  ;;  %v365_v30 = vadd.f32 %v628_v24, %v724_v12  ;;  %v324_v31 = vpop.f32.mrf.mxu0  ;;  %v356_v32 = vpop.f32.mrf.mxu1 }
  0xdf   : > { %467 = vst.msk [vmem:[%s735_s29 + $0x8] sm:$0xf] %vm464_vm2, %v586_v25  ;;  %475 = vst.msk [vmem:[%s735_s29 + $0x28] sm:$0xf] %vm464_vm2, %v594_v26  ;;  %v584_v33 = vpack.c.bf16 %v384_v27, %v384_v27  ;;  %v592_v34 = vpack.c.bf16 %v392_v28, %v392_v28  ;;  %v325_v35 = vadd.f32 %v724_v12, %v324_v31 }
  0xe0   : > { %v357_v36 = vadd.f32 %v724_v12, %v356_v32  ;;  %v387_v37 = vmax.f32 %v333_v29, 0.0  ;;  %v395_v38 = vmax.f32 %v365_v30, 0.0  ;;  %v623_v39 = vpop.f32.mrf.mxu0  ;;  %v631_v40 = vpop.f32.mrf.mxu1 }
  0xe1   : > { %465 = vst.msk [vmem:[%s735_s29] sm:$0xf] %vm464_vm2, %v584_v33  ;;  %473 = vst.msk [vmem:[%s735_s29 + $0x20] sm:$0xf] %vm464_vm2, %v592_v34  ;;  %v385_v41 = vmax.f32 %v325_v35, 0.0  ;;  %v346_v43 = vadd.f32 %v623_v39, %v724_v12  ;;  %v378_v44 = vadd.f32 %v631_v40, %v724_v12 }
  0xe2   : > { %v393_v42 = vmax.f32 %v357_v36, 0.0  ;;  %v587_v45 = vpack.c.bf16 %v387_v37, %v387_v37  ;;  %v595_v46 = vpack.c.bf16 %v395_v38, %v395_v38  ;;  %v337_v47 = vpop.f32.mrf.mxu0  ;;  %v369_v48 = vpop.f32.mrf.mxu1 }
  0xe3   : > { %v585_v49 = vpack.c.bf16 %v385_v41, %v385_v41  ;;  %v390_v51 = vmax.f32 %v346_v43, 0.0  ;;  %v398_v52 = vmax.f32 %v378_v44, 0.0  ;;  %v338_v53 = vadd.f32 %v724_v12, %v337_v47 }
  0xe4   : > { %v593_v50 = vpack.c.bf16 %v393_v42, %v393_v42  ;;  %468 = vst.msk [vmem:[%s735_s29 + $0xc] sm:$0xf] %vm464_vm2, %v587_v45  ;;  %476 = vst.msk [vmem:[%s735_s29 + $0x2c] sm:$0xf] %vm464_vm2, %v595_v46  ;;  %v370_v54 = vadd.f32 %v724_v12, %v369_v48  ;;  %v624_v55 = vpop.f32.mrf.mxu0  ;;  %v632_v56 = vpop.f32.mrf.mxu1 }
  0xe5   : > { %466 = vst.msk [vmem:[%s735_s29 + $0x4] sm:$0xf] %vm464_vm2, %v585_v49  ;;  %v590_v57 = vpack.c.bf16 %v390_v51, %v390_v51  ;;  %v598_v58 = vpack.c.bf16 %v398_v52, %v398_v52  ;;  %v349_v59 = vadd.f32 %v624_v55, %v724_v12  ;;  %v381_v60 = vadd.f32 %v632_v56, %v724_v12 }
  0xe6   : > { %474 = vst.msk [vmem:[%s735_s29 + $0x24] sm:$0xf] %vm464_vm2, %v593_v50  ;;  %v388_v61 = vmax.f32 %v338_v53, 0.0  ;;  %v396_v62 = vmax.f32 %v370_v54, 0.0  ;;  %v340_v63 = vpop.f32.mrf.mxu0  ;;  %v372_v0 = vpop.f32.mrf.mxu1 }
  0xe7   : > { %471 = vst.msk [vmem:[%s735_s29 + $0x18] sm:$0xf] %vm464_vm2, %v590_v57  ;;  %479 = vst.msk [vmem:[%s735_s29 + $0x38] sm:$0xf] %vm464_vm2, %v598_v58  ;;  %v391_v1 = vmax.f32 %v349_v59, 0.0  ;;  %v399_v2 = vmax.f32 %v381_v60, 0.0  ;;  %v341_v3 = vadd.f32 %v724_v12, %v340_v63  ;;  %v373_v4 = vadd.f32 %v724_v12, %v372_v0 }
  0xe8   : > { %v588_v5 = vpack.c.bf16 %v388_v61, %v388_v61  ;;  %v596_v6 = vpack.c.bf16 %v396_v62, %v396_v62 }
  0xe9   : > { %v591_v7 = vpack.c.bf16 %v391_v1, %v391_v1  ;;  %v599_v8 = vpack.c.bf16 %v399_v2, %v399_v2  ;;  %v389_v9 = vmax.f32 %v341_v3, 0.0  ;;  %v397_v10 = vmax.f32 %v373_v4, 0.0 }
  0xea   : > { %469 = vst.msk [vmem:[%s735_s29 + $0x10] sm:$0xf] %vm464_vm2, %v588_v5  ;;  %477 = vst.msk [vmem:[%s735_s29 + $0x30] sm:$0xf] %vm464_vm2, %v596_v6 }
  0xeb   : > { %472 = vst.msk [vmem:[%s735_s29 + $0x1c] sm:$0xf] %vm464_vm2, %v591_v7  ;;  %480 = vst.msk [vmem:[%s735_s29 + $0x3c] sm:$0xf] %vm464_vm2, %v599_v8  ;;  %v589_v11 = vpack.c.bf16 %v389_v9, %v389_v9  ;;  %v597_v13 = vpack.c.bf16 %v397_v10, %v397_v10 }
  0xed   : > { %470 = vst.msk [vmem:[%s735_s29 + $0x14] sm:$0xf] %vm464_vm2, %v589_v11  ;;  %478 = vst.msk [vmem:[%s735_s29 + $0x34] sm:$0xf] %vm464_vm2, %v597_v13 }
  0xee PF: > { %s13_s12 = sadd.s32 1, %s666_s12  }
  0xef   : > { %p10_p4 = scmp.ge.s32.totalorder %s13_s12, 6  }
  0xf1   :  { %12 = sbr.rel (!%p10_p4) target bundleno = 1 (0x1), region = 62 }

// kernel: nf_basic_block_forward.3
= control target key start
LH: loop header
LB: loop body
LE: loop exit
PB: predicated region body
PF: predicated region fallthrough
CT: control target
= control target key end

     0   :  { %s3210_s19 = smov 0   ;;  %s4235_s0 = inlined_call_operand.vmem [shape: bf16[4,10,18,8], index: 0, kind: input, shape index: {}]   ;;  %s4236_s1 = inlined_call_operand.vmem [shape: bf16[9,8,8], index: 1, kind: input, shape index: {}]   ;;  %s4237_s2 = inlined_call_operand.vmem [shape: f32[1,8], index: 2, kind: input, shape index: {}]   ;;  %s4238_s3 = inlined_call_operand.vmem [shape: bf16[8,8], index: 3, kind: input, shape index: {}]   ;;  %s4239_s4 = inlined_call_operand.vmem [shape: f32[1,8], index: 4, kind: input, shape index: {}]   ;;  %s4240_s5 = inlined_call_operand.vmem [shape: bf16[8,8], index: 5, kind: input, shape index: {}]   ;;  %s4241_s6 = inlined_call_operand.vmem [shape: f32[1,8], index: 6, kind: input, shape index: {}]   ;;  %s4242_s7 = inlined_call_operand.vmem [shape: bf16[4,128,4], index: 7, kind: input, shape index: {}]   ;;  %s4243_s8 = inlined_call_operand.vmem [shape: bf16[4,8], index: 8, kind: input, shape index: {}]   ;;  %s4244_s9 = inlined_call_operand.vmem [shape: f32[1,8], index: 9, kind: input, shape index: {}]   ;;  %s4245_s10 = inlined_call_operand.<no memory space> [shape: f32[1,1], index: 10, kind: input, shape index: {}]   ;;  %s4246_s11 = inlined_call_operand.vmem [shape: f32[4,128,8], index: 11, kind: output, shape index: {}]  }
   0x1   :  { %16 = sst [smem:[#allocation2]] %s4245_s10 }
   0x2 LB: > { %s2546_s20 = sadd.s32 4294967295, %s3145_s19   ;;  %p2550_p0 = scmp.ge.s32.totalorder %s3145_s19, 1  ;;  %s3145_s19 = sphi %s3210_s19, %s22_s19  }
   0x3   : > { %p348_p1 = scmp.lt.s32.totalorder %s3145_s19, 5 }
   0x5   : > { %p349_p2 = pnand %p2550_p0, %p348_p1 }
   0x7   : > { %352 = sbr.rel (%p349_p2) target bundleno = 834 (0x342), region = 64 }
   0xc   : > { %v2564_v0 = vld [vmem:[%s4236_s1 + $0x4] sm:$0xf]  ;;  %vm594_vm0 = vcmask 1043456   ;;  %v477_v1 = vld [vmem:[%s4236_s1] sm:$0xf]  ;;  %p393_p3 = scmp.lt.s32.totalorder %s2546_s20, 3 }
   0xd   : > { %3026 = vmatprep.subr.msk.bf16.mxu0 %vm594_vm0, %v2564_v0  ;;  %v596_v2 = vsel %vm594_vm0, %v2564_v0, 0  ;;  %3027 = vmatprep.subr.msk.bf16.mxu1 %vm594_vm0, %v477_v1  ;;  %v720_v3 = vsel %vm594_vm0, %v477_v1, 0  ;;  %v2581_v4 = vld [vmem:[%s4236_s1 + $0x8] sm:$0xf]  ;;  %v2591_v5 = vld [vmem:[%s4236_s1 + $0xc] sm:$0xf] }
   0xe   : > { %2811 = vmatpush3.bf16.msra.mxu0 %v596_v2  ;;  %2829 = vmatpush3.bf16.msra.mxu1 %v720_v3  ;;  %s4308_s20 = smov (!%p393_p3, %s2546_s20), 3  ;;  %vm502_vm1 = vcmask 1046528   ;;  %vm569_vm2 = vcmask 64512   ;;  %v1033_v9 = vsel %vm594_vm0, %v2591_v5, 0  ;;  %v3274_v20 = vld [vmem:[%s4236_s1 + $0x14] sm:$0xf] }
   0xf   : > { %3028 = vmatprep.subr.msk.bf16.mxu0 %vm594_vm0, %v2581_v4  ;;  %3029 = vmatprep.subr.msk.bf16.mxu1 %vm594_vm0, %v2591_v5  ;;  %s3038_s28 = smul.u32 120, %s4308_s20  ;;  %v911_v31 = vsel %vm594_vm0, %v2581_v4, 0  ;;  %v3317_v41 = vld [vmem:[%s4236_s1 + $0x10] sm:$0xf]  ;;  %vm819_vm3 = vcmask 1045504   ;;  %vm1904_vm4 = vcmask 1041408  }
  0x10   : > { %vm1879_vm5 = vcmask 31744   ;;  %s2429_s10 = sld [smem:[#allocation2]]  ;;  %s2701_s25 = sshll.u32 %s4308_s20, 7 }
  0x11   : > { %s3242_s12 = scalar_lea.vmem %s4235_s0, %s3038_s28  ;;  %s2700_s28 = sshll.u32 %s4308_s20, 6 }
  0x12   : > { %v3245_v6 = vld [vmem:[%s3242_s12] sm:$0xff]   ;;  %v3248_v7 = vld [vmem:[%s3242_s12 + $0x8] sm:$0x1]  ;;  %v3251_v8 = vld [vmem:[%s3242_s12 + $0xc] sm:$0xff]   ;;  %s4141_s27 = scalar_lea.vmem %s4246_s11, %s2701_s25 }
  0x13   : > { %v439_v10 = vunpack.c.l.bf16 %v3245_v6  ;;  %v440_v11 = vunpack.c.h.bf16 %v3245_v6  ;;  %v441_v12 = vunpack.c.l.bf16 %v3248_v7  ;;  %v3258_v13 = vld [vmem:[%s3242_s12 + $0x14] sm:$0x1]  ;;  %v442_v14 = vunpack.c.l.bf16 %v3251_v8  ;;  %2830 = vmatprep.mubr.msk.bf16.mxu1 %vm569_vm2, %v3245_v6  ;;  %v3283_v23 = vld [vmem:[%s3242_s12 + $0x18] sm:$0xff]   ;;  %v3286_v24 = vld [vmem:[%s3242_s12 + $0x20] sm:$0x1] }
  0x14   : > { %v443_v15 = vunpack.c.h.bf16 %v3251_v8  ;;  %v444_v16 = vunpack.c.l.bf16 %v3258_v13  ;;  %2831 = vmatmul.mubr.msk.bf16.vlgmr.msra.gmra.mxu1 %vm569_vm2, %v3251_v8  ;;  %v3293_v28 = vld [vmem:[%s3242_s12 + $0x24] sm:$0xff]   ;;  %v3298_v32 = vld [vmem:[%s3242_s12 + $0x2c] sm:$0x1]  ;;  %v445_v34 = vunpack.c.l.bf16 %v3283_v23  ;;  %v446_v35 = vunpack.c.h.bf16 %v3283_v23  ;;  %v3307_v37 = vld [vmem:[%s3242_s12 + $0x30] sm:$0xff]  }
  0x15   : > { %v503_v17 = vrot.slane %v439_v10, 1  ;;  %v504_v18 = vrot.slane %v440_v11, 1  ;;  %v506_v19 = vrot.slane %v441_v12, 1  ;;  %v508_v21 = vrot.slane %v442_v14, 1  ;;  %2865 = vmatpush3.bf16.msra.mxu1 %v1033_v9  ;;  %v3327_v46 = vld [vmem:[%s3242_s12 + $0x38] sm:$0x1]  ;;  %2834 = vmatprep.mubr.msk.bf16.mxu1 %vm569_vm2, %v3283_v23 }
  0x16   : > { %v509_v22 = vrot.slane %v443_v15, 1  ;;  %v511_v27 = vrot.slane %v444_v16, 1  ;;  %3031 = vmatprep.subr.msk.bf16.mxu1 %vm594_vm0, %v3274_v20  ;;  %v447_v36 = vunpack.c.l.bf16 %v3286_v24  ;;  %v448_v39 = vunpack.c.l.bf16 %v3293_v28  ;;  %v3339_v50 = vld [vmem:[%s3242_s12 + $0x3c] sm:$0xff]   ;;  %v3347_v55 = vld [vmem:[%s3242_s12 + $0x44] sm:$0x1]  ;;  %v3358_v60 = vld [vmem:[%s3242_s12 + $0x48] sm:$0xff]  }
  0x17   : > { %v505_v25 = vsel %vm502_vm1, %v503_v17, %v504_v18  ;;  %v507_v26 = vsel %vm502_vm1, %v504_v18, %v506_v19  ;;  %v449_v40 = vunpack.c.h.bf16 %v3293_v28  ;;  %v513_v42 = vrot.slane %v445_v34, 1  ;;  %v3375_v4 = vld [vmem:[%s3242_s12 + $0x50] sm:$0x1] }
  0x18   : > { %v559_v29 = vpack.c.bf16 %v507_v26, %v505_v25  ;;  %v510_v30 = vsel %vm502_vm1, %v508_v21, %v509_v22  ;;  %v512_v33 = vsel %vm502_vm1, %v509_v22, %v511_v27  ;;  %v514_v43 = vrot.slane %v446_v35, 1  ;;  %v3390_v25 = vld [vmem:[%s3242_s12 + $0x54] sm:$0xff]   ;;  %v3393_v26 = vld [vmem:[%s3242_s12 + $0x5c] sm:$0x1] }
  0x19   : > { %v3310_v38 = vpack.c.bf16 %v512_v33, %v510_v30  ;;  %v516_v44 = vrot.slane %v447_v36, 1  ;;  %v450_v45 = vunpack.c.l.bf16 %v3298_v32  ;;  %v518_v47 = vrot.slane %v448_v39, 1 }
  0x1a   : > { %2812 = vmatprep.mubr.msk.bf16.mxu0 %vm569_vm2, %v559_v29  ;;  %v519_v48 = vrot.slane %v449_v40, 1  ;;  %v451_v49 = vunpack.c.l.bf16 %v3307_v37  ;;  %v515_v51 = vsel %vm502_vm1, %v513_v42, %v514_v43  ;;  %v452_v54 = vunpack.c.h.bf16 %v3307_v37 }
  0x1b   : > { %2813 = vmatmul.mubr.msk.bf16.vlgmr.msra.gmra.mxu0 %vm569_vm2, %v3310_v38  ;;  %v517_v52 = vsel %vm502_vm1, %v514_v43, %v516_v44  ;;  %v521_v53 = vrot.slane %v450_v45, 1  ;;  %v453_v58 = vunpack.c.l.bf16 %v3327_v46  ;;  %v454_v63 = vunpack.c.l.bf16 %v3339_v50 }
  0x1c   : > { %2847 = vmatpush3.bf16.msra.mxu0 %v911_v31  ;;  %v3349_v56 = vpack.c.bf16 %v517_v52, %v515_v51  ;;  %v520_v57 = vsel %vm502_vm1, %v518_v47, %v519_v48  ;;  %2835 = vmatmul.mubr.msk.bf16.gmra.mxu1 %vm569_vm2, %v3293_v28  ;;  %v523_v59 = vrot.slane %v451_v49, 1  ;;  %v524_v62 = vrot.slane %v452_v54, 1 }
  0x1d   : > { %3030 = vmatprep.subr.msk.bf16.mxu0 %vm594_vm0, %v3317_v41  ;;  %v522_v61 = vsel %vm502_vm1, %v519_v48, %v521_v53  ;;  %v526_v1 = vrot.slane %v453_v58, 1  ;;  %v455_v2 = vunpack.c.h.bf16 %v3339_v50  ;;  %v456_v3 = vunpack.c.l.bf16 %v3347_v55  ;;  %2838 = vmatprep.mubr.msk.bf16.mxu1 %vm569_vm2, %v3307_v37 }
  0x1e   : > { %2816 = vmatprep.mubr.msk.bf16.mxu0 %vm569_vm2, %v3349_v56  ;;  %v3368_v0 = vpack.c.bf16 %v522_v61, %v520_v57  ;;  %v525_v5 = vsel %vm502_vm1, %v523_v59, %v524_v62  ;;  %v528_v9 = vrot.slane %v454_v63, 1  ;;  %v457_v17 = vunpack.c.l.bf16 %v3358_v60 }
  0x1f   : > { %v527_v18 = vsel %vm502_vm1, %v524_v62, %v526_v1  ;;  %v529_v19 = vrot.slane %v455_v2, 1  ;;  %v531_v21 = vrot.slane %v456_v3, 1  ;;  %v458_v22 = vunpack.c.h.bf16 %v3358_v60 }
  0x20   : > { %v3395_v27 = vpack.c.bf16 %v527_v18, %v525_v5  ;;  %v459_v29 = vunpack.c.l.bf16 %v3375_v4  ;;  %v533_v30 = vrot.slane %v457_v17, 1  ;;  %v460_v44 = vunpack.c.l.bf16 %v3390_v25 }
  0x21   : > { %v530_v31 = vsel %vm502_vm1, %v528_v9, %v529_v19  ;;  %v532_v33 = vsel %vm502_vm1, %v529_v19, %v531_v21  ;;  %v534_v42 = vrot.slane %v458_v22, 1  ;;  %v461_v47 = vunpack.c.h.bf16 %v3390_v25  ;;  %v3459_v21 = vld [vmem:[%s3242_s12 + $0x6c] sm:$0xff]  }
  0x22   : > { %v536_v43 = vrot.slane %v459_v29, 1  ;;  %v462_v48 = vunpack.c.l.bf16 %v3393_v26  ;;  %v3419_v53 = vpack.c.bf16 %v532_v33, %v530_v31  ;;  %v538_v59 = vrot.slane %v460_v44, 1  ;;  %v3467_v33 = vld [vmem:[%s3242_s12 + $0x60] sm:$0xff]  }
  0x23   : > { %2817 = vmatmul.mubr.msk.bf16.gmra.mxu0 %vm569_vm2, %v3368_v0  ;;  %v535_v51 = vsel %vm502_vm1, %v533_v30, %v534_v42  ;;  %v539_v61 = vrot.slane %v461_v47, 1  ;;  %v820_v1 = vrot.slane %v439_v10, 2  ;;  %v821_v5 = vrot.slane %v440_v11, 2 }
  0x24   : > { %2820 = vmatprep.mubr.msk.bf16.mxu0 %vm569_vm2, %v3395_v27  ;;  %2839 = vmatmul.mubr.msk.bf16.gmra.mxu1 %vm569_vm2, %v3339_v50  ;;  %v537_v52 = vsel %vm502_vm1, %v534_v42, %v536_v43  ;;  %v541_v62 = vrot.slane %v462_v48, 1  ;;  %v823_v9 = vrot.slane %v441_v12, 2  ;;  %v825_v18 = vrot.slane %v442_v14, 2 }
  0x25   : > { %2842 = vmatprep.mubr.msk.bf16.mxu1 %vm569_vm2, %v3358_v60  ;;  %v3421_v57 = vpack.c.bf16 %v537_v52, %v535_v51  ;;  %v826_v19 = vrot.slane %v443_v15, 2  ;;  %v540_v6 = vsel %vm502_vm1, %v538_v59, %v539_v61  ;;  %v828_v10 = vrot.slane %v444_v16, 2  ;;  %v3456_v15 = vld [vmem:[%s3242_s12 + $0x68] sm:$0x1] }
  0x26   : > { %v542_v7 = vsel %vm502_vm1, %v539_v61, %v541_v62  ;;  %v822_v11 = vsel %vm819_vm3, %v820_v1, %v821_v5  ;;  %v824_v12 = vsel %vm819_vm3, %v821_v5, %v823_v9  ;;  %v830_v16 = vrot.slane %v445_v34, 2  ;;  %v438_v9 = vld [vmem:[%s3242_s12 + $0x74] sm:$0x1]  ;;  %s3745_s12 = scalar_lea.vmem %s4242_s7, %s2700_s28 }
  0x27   : > { %v3453_v14 = vpack.c.bf16 %v542_v7, %v540_v6  ;;  %v876_v30 = vpack.c.bf16 %v824_v12, %v822_v11  ;;  %v827_v13 = vsel %vm819_vm3, %v825_v18, %v826_v19  ;;  %v831_v31 = vrot.slane %v446_v35, 2 }
  0x28   : > { %v829_v42 = vsel %vm819_vm3, %v826_v19, %v828_v10  ;;  %v463_v43 = vunpack.c.l.bf16 %v3467_v33  ;;  %v464_v51 = vunpack.c.h.bf16 %v3467_v33  ;;  %v465_v52 = vunpack.c.l.bf16 %v3456_v15 }
  0x29   : > { %v466_v59 = vunpack.c.l.bf16 %v3459_v21  ;;  %v1165_v34 = vsel %vm594_vm0, %v3317_v41, 0  ;;  %v3487_v61 = vpack.c.bf16 %v829_v42, %v827_v13  ;;  %v832_v62 = vsel %vm819_vm3, %v830_v16, %v831_v31  ;;  %v3495_v41 = vld [vmem:[%s4236_s1 + $0x1c] sm:$0xf] }
  0x2a   : > { %v1151_v35 = vrot.slane %v463_v43, 1  ;;  %v1152_v24 = vrot.slane %v464_v51, 1  ;;  %v1154_v1 = vrot.slane %v465_v52, 1  ;;  %v467_v5 = vunpack.c.h.bf16 %v3459_v21 }
  0x2b   : > { %2821 = vmatmul.mubr.msk.bf16.gmra.mxu0 %vm569_vm2, %v3419_v53  ;;  %v1534_v19 = vrot.slane %v466_v59, 1  ;;  %v1663_v6 = vrot.slane %v466_v59, 2  ;;  %v835_v7 = vrot.slane %v448_v39, 2  ;;  %v836_v10 = vrot.slane %v449_v40, 2 }
  0x2c   : > { %2824 = vmatprep.mubr.msk.bf16.mxu0 %vm569_vm2, %v3421_v57  ;;  %2843 = vmatmul.mubr.msk.bf16.gmra.mxu1 %vm569_vm2, %v3390_v25  ;;  %v1153_v18 = vsel %vm502_vm1, %v1151_v35, %v1152_v24  ;;  %v1155_v11 = vsel %vm502_vm1, %v1152_v24, %v1154_v1  ;;  %v1535_v12 = vrot.slane %v467_v5, 1  ;;  %v1664_v16 = vrot.slane %v467_v5, 2  ;;  %v2619_v24 = vld [vmem:[%s4236_s1 + $0x18] sm:$0xf] }
  0x2d   : > { %2866 = vmatprep.mubr.msk.bf16.mxu1 %vm569_vm2, %v3251_v8  ;;  %v833_v8 = vrot.slane %v447_v36, 2  ;;  %v1294_v36 = vsel %vm594_vm0, %v3274_v20, 0  ;;  %v3512_v13 = vpack.c.bf16 %v1155_v11, %v1153_v18  ;;  %v468_v39 = vunpack.c.l.bf16 %v438_v9 }
  0x2e   : > { %v840_v40 = vrot.slane %v451_v49, 2  ;;  %v841_v42 = vrot.slane %v452_v54, 2  ;;  %v843_v32 = vrot.slane %v453_v58, 2  ;;  %v3528_v59 = vsel %vm819_vm3, %v1663_v6, %v1664_v16 }
  0x2f   : > { %v834_v20 = vsel %vm819_vm3, %v831_v31, %v833_v8  ;;  %v3523_v8 = vsel %vm502_vm1, %v1534_v19, %v1535_v12  ;;  %v1666_v35 = vrot.slane %v468_v39, 2  ;;  %v837_v49 = vsel %vm819_vm3, %v835_v7, %v836_v10 }
  0x30   : > { %v3516_v31 = vpack.c.bf16 %v834_v20, %v832_v62  ;;  %v842_v1 = vsel %vm819_vm3, %v840_v40, %v841_v42  ;;  %v844_v5 = vsel %vm819_vm3, %v841_v42, %v843_v32  ;;  %v845_v20 = vrot.slane %v454_v63, 2 }
  0x31   : > { %v3540_v46 = vsel %vm819_vm3, %v1664_v16, %v1666_v35  ;;  %v3558_v9 = vpack.c.bf16 %v844_v5, %v842_v1  ;;  %v846_v18 = vrot.slane %v455_v2, 2  ;;  %v848_v19 = vrot.slane %v456_v3, 2 }
  0x32   : > { %v1670_v62 = vpack.c.bf16 %v3540_v46, %v3528_v59  ;;  %v850_v6 = vrot.slane %v457_v17, 2  ;;  %v851_v7 = vrot.slane %v458_v22, 2  ;;  %v855_v22 = vrot.slane %v460_v44, 2 }
  0x33   : > { %2825 = vmatmul.mubr.msk.bf16.gmra.mxu0 %vm569_vm2, %v3453_v14  ;;  %v847_v63 = vsel %vm819_vm3, %v845_v20, %v846_v18  ;;  %v849_v55 = vsel %vm819_vm3, %v846_v18, %v848_v19  ;;  %v858_v11 = vrot.slane %v462_v48, 2  ;;  %v1548_v26 = vsel %vm594_vm0, %v3495_v41, 0  ;;  %v2637_v48 = vld [vmem:[%s4236_s1 + $0x20] sm:$0xf] }
  0x34   : > { %2848 = vmatprep.mubr.msk.bf16.mxu0 %vm569_vm2, %v876_v30  ;;  %2867 = vmatmul.mubr.msk.bf16.vlgmr.msra.gmra.mxu1 %vm569_vm2, %v3283_v23  ;;  %v838_v30 = vrot.slane %v450_v45, 2  ;;  %v1537_v45 = vrot.slane %v468_v39, 1  ;;  %v852_v2 = vsel %vm819_vm3, %v850_v6, %v851_v7  ;;  %v881_v4 = vpack.c.bf16 %v849_v55, %v847_v63 }
  0x35   : > { %2870 = vmatprep.mubr.msk.bf16.mxu1 %vm569_vm2, %v3293_v28  ;;  %2901 = vmatpush3.bf16.msra.mxu1 %v1294_v36  ;;  %v1677_v15 = vsel %vm594_vm0, %v2637_v48, 0 }
  0x36   : > { %3033 = vmatprep.subr.msk.bf16.mxu1 %vm594_vm0, %v3495_v41  ;;  %v3537_v54 = vsel %vm502_vm1, %v1535_v12, %v1537_v45  ;;  %v839_v58 = vsel %vm819_vm3, %v836_v10, %v838_v30  ;;  %v853_v10 = vrot.slane %v459_v29, 2  ;;  %v856_v29 = vrot.slane %v461_v47, 2 }
  0x37   : > { %v1541_v36 = vpack.c.bf16 %v3537_v54, %v3523_v8  ;;  %v1416_v47 = vsel %vm594_vm0, %v2619_v24, 0  ;;  %v1283_v41 = vrot.slane %v465_v52, 2 }
  0x38   : > { %v854_v3 = vsel %vm819_vm3, %v851_v7, %v853_v10  ;;  %v857_v12 = vsel %vm819_vm3, %v855_v22, %v856_v29  ;;  %v859_v30 = vsel %vm819_vm3, %v856_v29, %v858_v11 }
  0x39   : > { %v882_v17 = vpack.c.bf16 %v854_v3, %v852_v2  ;;  %v883_v44 = vpack.c.bf16 %v859_v30, %v857_v12 }
  0x3b   : > { %2849 = vmatmul.mubr.msk.bf16.vlgmr.msra.gmra.mxu0 %vm569_vm2, %v3487_v61 }
  0x3c   : > { %2883 = vmatpush3.bf16.msra.mxu0 %v1165_v34  ;;  %2852 = vmatprep.mubr.msk.bf16.mxu0 %vm569_vm2, %v3516_v31  ;;  %v3556_v34 = vpack.c.bf16 %v839_v58, %v837_v49 }
  0x3d   : > { %2871 = vmatmul.mubr.msk.bf16.gmra.mxu1 %vm569_vm2, %v3307_v37  ;;  %3032 = vmatprep.subr.msk.bf16.mxu0 %vm594_vm0, %v2619_v24 }
  0x3e   : > { %2874 = vmatprep.mubr.msk.bf16.mxu1 %vm569_vm2, %v3339_v50 }
  0x43   : > { %2853 = vmatmul.mubr.msk.bf16.gmra.mxu0 %vm569_vm2, %v3556_v34 }
  0x44   : > { %2856 = vmatprep.mubr.msk.bf16.mxu0 %vm569_vm2, %v3558_v9 }
  0x45   : > { %2875 = vmatmul.mubr.msk.bf16.gmra.mxu1 %vm569_vm2, %v3358_v60 }
  0x46   : > { %2878 = vmatprep.mubr.msk.bf16.mxu1 %vm569_vm2, %v3390_v25 }
  0x4b   : > { %2857 = vmatmul.mubr.msk.bf16.gmra.mxu0 %vm569_vm2, %v881_v4 }
  0x4c   : > { %2860 = vmatprep.mubr.msk.bf16.mxu0 %vm569_vm2, %v882_v17 }
  0x4d   : > { %2879 = vmatmul.mubr.msk.bf16.gmra.mxu1 %vm569_vm2, %v3467_v33 }
  0x4e   : > { %2902 = vmatprep.mubr.msk.bf16.mxu1 %vm569_vm2, %v3487_v61  ;;  %v1281_v61 = vrot.slane %v464_v51, 2 }
  0x53   : > { %2861 = vmatmul.mubr.msk.bf16.gmra.mxu0 %vm569_vm2, %v883_v44 }
  0x54   : > { %2884 = vmatprep.mubr.msk.bf16.mxu0 %vm569_vm2, %v3310_v38  ;;  %v1280_v38 = vrot.slane %v463_v43, 2  ;;  %v1284_v43 = vsel %vm819_vm3, %v1281_v61, %v1283_v41 }
  0x55   : > { %2903 = vmatmul.mubr.msk.bf16.vlgmr.msra.gmra.mxu1 %vm569_vm2, %v3516_v31 }
  0x56   : > { %2906 = vmatprep.mubr.msk.bf16.mxu1 %vm569_vm2, %v3556_v34  ;;  %2937 = vmatpush3.bf16.msra.mxu1 %v1548_v26  ;;  %v1282_v16 = vsel %vm819_vm3, %v1280_v38, %v1281_v61 }
  0x57   : > { %v1287_v39 = vpack.c.bf16 %v1284_v43, %v1282_v16 }
  0x5b   : > { %2885 = vmatmul.mubr.msk.bf16.vlgmr.msra.gmra.mxu0 %vm569_vm2, %v3349_v56 }
  0x5c   : > { %2919 = vmatpush3.bf16.msra.mxu0 %v1416_v47  ;;  %2888 = vmatprep.mubr.msk.bf16.mxu0 %vm569_vm2, %v3368_v0 }
  0x5d   : > { %2907 = vmatmul.mubr.msk.bf16.gmra.mxu1 %vm569_vm2, %v3558_v9  ;;  %3034 = vmatprep.subr.msk.bf16.mxu0 %vm594_vm0, %v2637_v48 }
  0x5e   : > { %2910 = vmatprep.mubr.msk.bf16.mxu1 %vm569_vm2, %v881_v4 }
  0x63   : > { %2889 = vmatmul.mubr.msk.bf16.gmra.mxu0 %vm569_vm2, %v3395_v27 }
  0x64   : > { %2892 = vmatprep.mubr.msk.bf16.mxu0 %vm569_vm2, %v3419_v53 }
  0x65   : > { %2911 = vmatmul.mubr.msk.bf16.gmra.mxu1 %vm569_vm2, %v882_v17 }
  0x66   : > { %2914 = vmatprep.mubr.msk.bf16.mxu1 %vm569_vm2, %v883_v44 }
  0x6b   : > { %2893 = vmatmul.mubr.msk.bf16.gmra.mxu0 %vm569_vm2, %v3421_v57 }
  0x6c   : > { %2896 = vmatprep.mubr.msk.bf16.mxu0 %vm569_vm2, %v3453_v14 }
  0x6d   : > { %2915 = vmatmul.mubr.msk.bf16.gmra.mxu1 %vm569_vm2, %v1287_v39 }
  0x6e   : > { %2938 = vmatprep.mubr.msk.bf16.mxu1 %vm569_vm2, %v3349_v56 }
  0x73   : > { %2897 = vmatmul.mubr.msk.bf16.gmra.mxu0 %vm569_vm2, %v3512_v13 }
  0x74   : > { %2920 = vmatprep.mubr.msk.bf16.mxu0 %vm569_vm2, %v3283_v23  ;;  %v2013_v23 = vld [vmem:[%s4238_s3] sm:$0xf] }
  0x75   : > { %2939 = vmatmul.mubr.msk.bf16.vlgmr.msra.gmra.mxu1 %vm569_vm2, %v3368_v0 }
  0x76   : > { %2942 = vmatprep.mubr.msk.bf16.mxu1 %vm569_vm2, %v3395_v27 }
  0x7b   : > { %2921 = vmatmul.mubr.msk.bf16.vlgmr.msra.gmra.mxu0 %vm569_vm2, %v3293_v28  ;;  %v2046_v28 = vsel %vm594_vm0, %v2013_v23, 0 }
  0x7c   : > { %2955 = vmatpush3.bf16.msra.mxu0 %v1677_v15  ;;  %2924 = vmatprep.mubr.msk.bf16.mxu0 %vm569_vm2, %v3307_v37 }
  0x7d   : > { %2943 = vmatmul.mubr.msk.bf16.gmra.mxu1 %vm569_vm2, %v3419_v53  ;;  %3036 = vmatprep.subr.msk.bf16.mxu0 %vm594_vm0, %v2013_v23  ;;  %v1831_v23 = vld [vmem:[%s4243_s8] sm:$0x3] }
  0x7e   : > { %2946 = vmatprep.mubr.msk.bf16.mxu1 %vm569_vm2, %v3421_v57  ;;  %3035 = vmatprep.subr.msk.bf16.mxu1 %vm1904_vm4, %v1831_v23 }
  0x83   : > { %2925 = vmatmul.mubr.msk.bf16.gmra.mxu0 %vm569_vm2, %v3339_v50 }
  0x84   : > { %2928 = vmatprep.mubr.msk.bf16.mxu0 %vm569_vm2, %v3358_v60 }
  0x85   : > { %2947 = vmatmul.mubr.msk.bf16.gmra.mxu1 %vm569_vm2, %v3453_v14 }
  0x86   : > { %2950 = vmatprep.mubr.msk.bf16.mxu1 %vm569_vm2, %v3512_v13 }
  0x8b   : > { %2929 = vmatmul.mubr.msk.bf16.gmra.mxu0 %vm569_vm2, %v3390_v25 }
  0x8c   : > { %2932 = vmatprep.mubr.msk.bf16.mxu0 %vm569_vm2, %v3467_v33 }
  0x8d   : > { %2951 = vmatmul.mubr.msk.bf16.gmra.mxu1 %vm569_vm2, %v1541_v36 }
  0x93   : > { %2933 = vmatmul.mubr.msk.bf16.gmra.mxu0 %vm569_vm2, %v3459_v21 }
  0x94   : > { %2956 = vmatprep.mubr.msk.bf16.mxu0 %vm569_vm2, %v3516_v31 }
  0x9b   : > { %2957 = vmatmul.mubr.msk.bf16.vlgmr.msra.gmra.mxu0 %vm569_vm2, %v3556_v34 }
  0x9c   : > { %2960 = vmatprep.mubr.msk.bf16.mxu0 %vm569_vm2, %v3558_v9  ;;  %2991 = vmatpush3.bf16.msra.mxu0 %v2046_v28 }
  0xa3   : > { %2961 = vmatmul.mubr.msk.bf16.gmra.mxu0 %vm569_vm2, %v881_v4 }
  0xa4   : > { %2964 = vmatprep.mubr.msk.bf16.mxu0 %vm569_vm2, %v882_v17 }
  0xab   : > { %2965 = vmatmul.mubr.msk.bf16.gmra.mxu0 %vm569_vm2, %v883_v44 }
  0xac   : > { %2968 = vmatprep.mubr.msk.bf16.mxu0 %vm569_vm2, %v1287_v39 }
  0xb3   : > { %2969 = vmatmul.mubr.msk.bf16.gmra.mxu0 %vm569_vm2, %v1670_v62 }
  0xd4   : > { %v2832_v37 = vpop.f32.mrf.mxu1 }
  0xd6   : > { %v756_v50 = vpop.f32.mrf.mxu1 }
  0xd8   : > { %v2833_v56 = vpop.f32.mrf.mxu1 }
  0xda   : > { %v759_v0 = vpop.f32.mrf.mxu1 }
  0xdb   : > { %v2814_v60 = vpop.f32.mrf.mxu0 }
  0xdc   : > { %v765_v25 = vadd.f32 %v2832_v37, %v2814_v60  ;;  %v2836_v53 = vpop.f32.mrf.mxu1  ;;  %v1906_v37 = vsel %vm1904_vm4, %v1831_v23, 0 }
  0xdd   : > { %v632_v27 = vpop.f32.mrf.mxu0  ;;  %2973 = vmatpush3.bf16.msra.mxu1 %v1906_v37 }
  0xde   : > { %v757_v57 = vadd.f32 %v756_v50, %v632_v27  ;;  %v772_v21 = vpop.f32.mrf.mxu1  ;;  %v2169_v50 = vld [vmem:[%s4240_s5] sm:$0xf]  ;;  %v3058_v27 = vld [vmem:[%s3745_s12 + $0x8] sm:$0xff]  }
  0xdf   : > { %v2815_v14 = vpop.f32.mrf.mxu0  ;;  %3037 = vmatprep.subr.msk.bf16.mxu1 %vm594_vm0, %v2169_v50 }
  0xe0   : > { %v768_v33 = vadd.f32 %v2833_v56, %v2815_v14  ;;  %v2837_v52 = vpop.f32.mrf.mxu1 }
  0xe1   : > { %v635_v51 = vpop.f32.mrf.mxu0 }
  0xe2   : > { %v760_v13 = vadd.f32 %v759_v0, %v635_v51  ;;  %v775_v40 = vpop.f32.mrf.mxu1  ;;  %v3057_v0 = vld [vmem:[%s3745_s12] sm:$0xff]  }
  0xe3   : > { %v2818_v31 = vpop.f32.mrf.mxu0  ;;  %2974 = vmatprep.mubr.msk.bf16.mxu1 %vm1879_vm5, %v3057_v0 }
  0xe4   : > { %v781_v42 = vadd.f32 %v2836_v53, %v2818_v31  ;;  %v2840_v32 = vpop.f32.mrf.mxu1  ;;  %v2202_v53 = vsel %vm594_vm0, %v2169_v50, 0  ;;  %2975 = vmatmul.mubr.msk.bf16.vlgmr.msra.gmra.mxu1 %vm1879_vm5, %v3058_v27 }
  0xe5   : > { %v648_v8 = vpop.f32.mrf.mxu0  ;;  %3009 = vmatpush3.bf16.msra.mxu1 %v2202_v53 }
  0xe6   : > { %v3694_v45 = vadd.f32 %v772_v21, %v648_v8  ;;  %v788_v35 = vpop.f32.mrf.mxu1  ;;  %v3059_v21 = vld [vmem:[%s3745_s12 + $0x10] sm:$0xff]   ;;  %v3060_v8 = vld [vmem:[%s3745_s12 + $0x18] sm:$0xff]  }
  0xe7   : > { %v2819_v59 = vpop.f32.mrf.mxu0  ;;  %2978 = vmatprep.mubr.msk.bf16.mxu1 %vm1879_vm5, %v3059_v21 }
  0xe8   : > { %v3696_v24 = vadd.f32 %v2837_v52, %v2819_v59  ;;  %v2841_v54 = vpop.f32.mrf.mxu1  ;;  %v3061_v59 = vld [vmem:[%s3745_s12 + $0x20] sm:$0xff]  }
  0xe9   : > { %v651_v49 = vpop.f32.mrf.mxu0 }
  0xea   : > { %v3698_v46 = vadd.f32 %v775_v40, %v651_v49  ;;  %v791_v36 = vpop.f32.mrf.mxu1 }
  0xeb   : > { %v2822_v58 = vpop.f32.mrf.mxu0 }
  0xec   : > { %v3700_v62 = vadd.f32 %v2840_v32, %v2822_v58  ;;  %v2844_v5 = vpop.f32.mrf.mxu1  ;;  %2979 = vmatmul.mubr.msk.bf16.gmra.mxu1 %vm1879_vm5, %v3060_v8 }
  0xed   : > { %v664_v1 = vpop.f32.mrf.mxu0  ;;  %2982 = vmatprep.mubr.msk.bf16.mxu1 %vm1879_vm5, %v3061_v59 }
  0xee   : > { %v3702_v34 = vadd.f32 %v788_v35, %v664_v1  ;;  %v804_v20 = vpop.f32.mrf.mxu1 }
  0xef   : > { %v2823_v9 = vpop.f32.mrf.mxu0 }
  0xf0   : > { %v3704_v18 = vadd.f32 %v2841_v54, %v2823_v9  ;;  %v2845_v6 = vpop.f32.mrf.mxu1  ;;  %v3062_v9 = vld [vmem:[%s3745_s12 + $0x28] sm:$0xff]  }
  0xf1   : > { %v667_v19 = vpop.f32.mrf.mxu0 }
  0xf2   : > { %v3706_v7 = vadd.f32 %v791_v36, %v667_v19  ;;  %v807_v63 = vpop.f32.mrf.mxu1  ;;  %v3063_v19 = vld [vmem:[%s3745_s12 + $0x30] sm:$0xff]  }
  0xf3   : > { %v2826_v10 = vpop.f32.mrf.mxu0 }
  0xf4   : > { %v3708_v55 = vadd.f32 %v2844_v5, %v2826_v10  ;;  %v3710_v3 = vpop.f32.mrf.mxu1  ;;  %2983 = vmatmul.mubr.msk.bf16.gmra.mxu1 %vm1879_vm5, %v3062_v9 }
  0xf5   : > { %v680_v2 = vpop.f32.mrf.mxu0  ;;  %2986 = vmatprep.mubr.msk.bf16.mxu1 %vm1879_vm5, %v3063_v19 }
  0xf6   : > { %v3712_v4 = vadd.f32 %v804_v20, %v680_v2  ;;  %v3714_v22 = vpop.f32.mrf.mxu1 }
  0xf7   : > { %v2827_v17 = vpop.f32.mrf.mxu0 }
  0xf8   : > { %v3716_v29 = vadd.f32 %v2845_v6, %v2827_v17  ;;  %v3718_v12 = vpop.f32.mrf.mxu1 }
  0xf9   : > { %v683_v11 = vpop.f32.mrf.mxu0 }
  0xfa   : > { %v3720_v30 = vadd.f32 %v807_v63, %v683_v11  ;;  %v3722_v26 = vpop.f32.mrf.mxu1 }
  0xfb   : > { %v2850_v44 = vpop.f32.mrf.mxu0 }
  0xfc   : > { %v3724_v47 = vadd.f32 %v2850_v44, %v765_v25 }
  0xfd   : > { %v947_v48 = vpop.f32.mrf.mxu0  ;;  %v3726_v38 = vpop.f32.mrf.mxu1 }
  0xfe   : > { %v3728_v61 = vadd.f32 %v947_v48, %v757_v57  ;;  %v3064_v48 = vld [vmem:[%s3745_s12 + $0x38] sm:$0xff]  }
  0xff   : > { %v2851_v41 = vpop.f32.mrf.mxu0  ;;  %v3730_v16 = vpop.f32.mrf.mxu1  ;;  %2987 = vmatmul.mubr.msk.bf16.gmra.mxu1 %vm1879_vm5, %v3064_v48 }
 0x100   : > { %v3732_v43 = vadd.f32 %v2851_v41, %v768_v33 }
 0x101   : > { %v950_v39 = vpop.f32.mrf.mxu0  ;;  %v3734_v15 = vpop.f32.mrf.mxu1 }
 0x102   : > { %v3740_v28 = vadd.f32 %v950_v39, %v760_v13 }
 0x103   : > { %v2854_v56 = vpop.f32.mrf.mxu0  ;;  %v3750_v60 = vpop.f32.mrf.mxu1 }
 0x104   : > { %v3753_v25 = vadd.f32 %v2854_v56, %v781_v42 }
 0x105   : > { %v963_v57 = vpop.f32.mrf.mxu0  ;;  %v3758_v14 = vpop.f32.mrf.mxu1 }
 0x106   : > { %v3763_v33 = vadd.f32 %v963_v57, %v3694_v45 }
 0x107   : > { %v2855_v51 = vpop.f32.mrf.mxu0  ;;  %v3766_v52 = vpop.f32.mrf.mxu1 }
 0x108   : > { %v3770_v13 = vadd.f32 %v2855_v51, %v3696_v24 }
 0x109   : > { %v966_v31 = vpop.f32.mrf.mxu0  ;;  %v3772_v40 = vpop.f32.mrf.mxu1 }
 0x10a   : > { %v3775_v42 = vadd.f32 %v966_v31, %v3698_v46 }
 0x10b   : > { %v2858_v32 = vpop.f32.mrf.mxu0  ;;  %v3778_v45 = vpop.f32.mrf.mxu1 }
 0x10c   : > { %v3782_v35 = vadd.f32 %v2858_v32, %v3700_v62 }
 0x10d   : > { %v979_v49 = vpop.f32.mrf.mxu0  ;;  %v3784_v54 = vpop.f32.mrf.mxu1 }
 0x10e   : > { %4247 = vst [vmem:[#allocation3_spill] sm:$0xff] %v3784_v54  ;;  %v3787_v24 = vadd.f32 %v979_v49, %v3702_v34 }
 0x10f   : > { %v2859_v46 = vpop.f32.mrf.mxu0  ;;  %v3790_v58 = vpop.f32.mrf.mxu1 }
 0x110   : > { %4248 = vst [vmem:[#allocation4_spill] sm:$0xff] %v3790_v58  ;;  %v3794_v36 = vadd.f32 %v2859_v46, %v3704_v18 }
 0x111   : > { %v982_v1 = vpop.f32.mrf.mxu0  ;;  %v3796_v5 = vpop.f32.mrf.mxu1 }
 0x112   : > { %4249 = vst [vmem:[#allocation5_spill] sm:$0xff] %v3796_v5  ;;  %v3799_v62 = vadd.f32 %v982_v1, %v3706_v7 }
 0x113   : > { %v2862_v34 = vpop.f32.mrf.mxu0  ;;  %v3802_v20 = vpop.f32.mrf.mxu1 }
 0x114   : > { %4250 = vst [vmem:[#allocation6_spill] sm:$0xff] %v3802_v20  ;;  %v3806_v6 = vadd.f32 %v2862_v34, %v3708_v55 }
 0x115   : > { %v995_v10 = vpop.f32.mrf.mxu0  ;;  %v3808_v63 = vpop.f32.mrf.mxu1 }
 0x116   : > { %4251 = vst [vmem:[#allocation7_spill] sm:$0xff] %v3806_v6  ;;  %v3811_v18 = vadd.f32 %v995_v10, %v3712_v4  ;;  %v1132_v6 = vadd.f32 %v3714_v22, %v3728_v61 }
 0x117   : > { %v2863_v2 = vpop.f32.mrf.mxu0  ;;  %v3814_v7 = vpop.f32.mrf.mxu1 }
 0x118   : > { %4252 = vst [vmem:[#allocation8_spill] sm:$0xff] %v3811_v18  ;;  %v3818_v17 = vadd.f32 %v2863_v2, %v3716_v29 }
 0x119   : > { %v998_v11 = vpop.f32.mrf.mxu0  ;;  %v3820_v44 = vpop.f32.mrf.mxu1 }
 0x11a   : > { %4253 = vst [vmem:[#allocation9_spill] sm:$0xff] %v3818_v17  ;;  %v3823_v55 = vadd.f32 %v998_v11, %v3720_v30 }
 0x11b   : > { %v2886_v41 = vpop.f32.mrf.mxu0  ;;  %v3826_v4 = vpop.f32.mrf.mxu1 }
 0x11c   : > { %4254 = vst [vmem:[#allocation10_spill] sm:$0xff] %v3823_v55 }
 0x11d   : > { %v1201_v39 = vpop.f32.mrf.mxu0  ;;  %v3828_v23 = vpop.f32.mrf.mxu1 }
 0x11f   : > { %v2887_v37 = vpop.f32.mrf.mxu0  ;;  %v3831_v50 = vpop.f32.mrf.mxu1 }
 0x121   : > { %v1204_v29 = vpop.f32.mrf.mxu0  ;;  %v3833_v56 = vpop.f32.mrf.mxu1 }
 0x123   : > { %v3835_v0 = vpop.f32.mrf.mxu0  ;;  %v3837_v27 = vpop.f32.mrf.mxu1 }
 0x125   : > { %v1217_v30 = vpop.f32.mrf.mxu0  ;;  %v3839_v53 = vpop.f32.mrf.mxu1 }
 0x126   : > { %4255 = vst [vmem:[#allocation11_spill] sm:$0xff] %v3839_v53 }
 0x127   : > { %v3841_v57 = vpop.f32.mrf.mxu0  ;;  %v3843_v21 = vpop.f32.mrf.mxu1 }
 0x128   : > { %4256 = vst [vmem:[#allocation12_spill] sm:$0xff] %v3843_v21 }
 0x129   : > { %v3845_v51 = vpop.f32.mrf.mxu0  ;;  %v3847_v31 = vpop.f32.mrf.mxu1 }
 0x12a   : > { %4257 = vst [vmem:[#allocation13_spill] sm:$0xff] %v3847_v31 }
 0x12b   : > { %v3849_v8 = vpop.f32.mrf.mxu0  ;;  %v3851_v32 = vpop.f32.mrf.mxu1 }
 0x12c   : > { %4258 = vst [vmem:[#allocation14_spill] sm:$0xff] %v3849_v8  ;;  %4259 = vst [vmem:[#allocation15_spill] sm:$0xff] %v3851_v32 }
 0x12d   : > { %v3853_v59 = vpop.f32.mrf.mxu0  ;;  %v3855_v49 = vpop.f32.mrf.mxu1 }
 0x12e   : > { %4260 = vst [vmem:[#allocation16_spill] sm:$0xff] %v3855_v49 }
 0x12f   : > { %v3857_v46 = vpop.f32.mrf.mxu0  ;;  %v3859_v1 = vpop.f32.mrf.mxu1 }
 0x130   : > { %4261 = vst [vmem:[#allocation17_spill] sm:$0xff] %v3859_v1 }
 0x131   : > { %v3861_v9 = vpop.f32.mrf.mxu0  ;;  %v3863_v34 = vpop.f32.mrf.mxu1 }
 0x132   : > { %4262 = vst [vmem:[#allocation18_spill] sm:$0xff] %v3861_v9  ;;  %4263 = vst [vmem:[#allocation19_spill] sm:$0xff] %v3863_v34  ;;  %v1134_v9 = vadd.f32 %v3710_v3, %v3724_v47  ;;  %v1136_v3 = vadd.f32 %v3730_v16, %v3763_v33  ;;  %v1137_v16 = vadd.f32 %v3750_v60, %v3775_v42 }
 0x133   : > { %v3865_v19 = vpop.f32.mrf.mxu0  ;;  %v3869_v2 = vpop.f32.mrf.mxu1 }
 0x134   : > { %4264 = vst [vmem:[#allocation20_spill] sm:$0xff] %v3865_v19  ;;  %4266 = vst [vmem:[#allocation22_spill] sm:$0xff] %v3869_v2  ;;  %v1266_v8 = vadd.f32 %v2886_v41, %v1134_v9 }
 0x135   : > { %v3867_v10 = vpop.f32.mrf.mxu0  ;;  %v2940_v20 = vpop.f32.mrf.mxu1 }
 0x136   : > { %4265 = vst [vmem:[#allocation21_spill] sm:$0xff] %v3867_v10  ;;  %v1395_v47 = vadd.f32 %v3808_v63, %v1266_v8 }
 0x137   : > { %v3871_v11 = vpop.f32.mrf.mxu0  ;;  %v1584_v32 = vpop.f32.mrf.mxu1 }
 0x138   : > { %4267 = vst [vmem:[#allocation23_spill] sm:$0xff] %v3871_v11 }
 0x139   : > { %v3873_v48 = vpop.f32.mrf.mxu0  ;;  %v2941_v5 = vpop.f32.mrf.mxu1 }
 0x13a   : > { %4268 = vst [vmem:[#allocation24_spill] sm:$0xff] %v3873_v48 }
 0x13b   : > { %v2922_v49 = vpop.f32.mrf.mxu0  ;;  %v1587_v34 = vpop.f32.mrf.mxu1 }
 0x13d   : > { %v1452_v55 = vpop.f32.mrf.mxu0  ;;  %v3877_v18 = vpop.f32.mrf.mxu1 }
 0x13e   : > { %4269 = vst [vmem:[#allocation25_spill] sm:$0xff] %v3877_v18  ;;  %v1135_v18 = vadd.f32 %v3718_v12, %v3732_v43 }
 0x13f   : > { %v2923_v53 = vpop.f32.mrf.mxu0  ;;  %v3883_v11 = vpop.f32.mrf.mxu1 }
 0x140   : > { %4272 = vst [vmem:[#allocation28_spill] sm:$0xff] %v3883_v11  ;;  %v1264_v11 = vadd.f32 %v1201_v39, %v1132_v6  ;;  %v1517_v39 = vadd.f32 %v2922_v49, %v1395_v47 }
 0x141   : > { %v1455_v1 = vpop.f32.mrf.mxu0  ;;  %v3889_v21 = vpop.f32.mrf.mxu1 }
 0x142   : > { %4275 = vst [vmem:[#allocation31_spill] sm:$0xff] %v3889_v21  ;;  %v1393_v12 = vadd.f32 %v3814_v7, %v1264_v11  ;;  %v1138_v7 = vadd.f32 %v3726_v38, %v3753_v25  ;;  %v1142_v38 = vadd.f32 %v3758_v14, %v3782_v35  ;;  %v4279_v11 = vld [vmem:[#allocation18_spill] sm:$0xff] }
 0x143   : > { %v3875_v17 = vpop.f32.mrf.mxu0  ;;  %v3903_v21 = vpop.f32.mrf.mxu1 }
 0x145   : > { %v1468_v58 = vpop.f32.mrf.mxu0 }
 0x147   : > { %v2927_v19 = vpop.f32.mrf.mxu0 }
 0x149   : > { %v3879_v10 = vpop.f32.mrf.mxu0 }
 0x14a   : > { %4270 = vst [vmem:[#allocation26_spill] sm:$0xff] %v3879_v10 }
 0x14b   : > { %v3881_v2 = vpop.f32.mrf.mxu0 }
 0x14c   : > { %4271 = vst [vmem:[#allocation27_spill] sm:$0xff] %v3881_v2 }
 0x14d   : > { %v3885_v48 = vpop.f32.mrf.mxu0 }
 0x14e   : > { %4273 = vst [vmem:[#allocation29_spill] sm:$0xff] %v3885_v48  ;;  %v1133_v48 = vadd.f32 %v3722_v26, %v3740_v28  ;;  %v3914_v26 = vpop.f32.mrf.mxu1  ;;  %v1139_v28 = vadd.f32 %v3734_v15, %v3770_v13  ;;  %v1269_v13 = vadd.f32 %v3845_v51, %v1137_v16  ;;  %v1143_v51 = vadd.f32 %v3772_v40, %v3794_v36 }
 0x14f   : > { %v3887_v31 = vpop.f32.mrf.mxu0 }
 0x150   : > { %4274 = vst [vmem:[#allocation30_spill] sm:$0xff] %v3887_v31  ;;  %v1267_v31 = vadd.f32 %v2887_v37, %v1135_v18  ;;  %v1265_v10 = vadd.f32 %v1204_v29, %v1133_v48  ;;  %v1515_v18 = vadd.f32 %v1452_v55, %v1393_v12  ;;  %v1271_v33 = vadd.f32 %v3841_v57, %v1139_v28  ;;  %v4280_v12 = vld [vmem:[#allocation28_spill] sm:$0xff]  ;;  %v4282_v28 = vld [vmem:[#allocation7_spill] sm:$0xff] }
 0x151   : > { %v3891_v54 = vpop.f32.mrf.mxu0  ;;  %v1270_v29 = vadd.f32 %v3835_v0, %v1138_v7  ;;  %v1140_v0 = vadd.f32 %v3766_v52, %v3787_v24  ;;  %v1398_v35 = vadd.f32 %v3837_v27, %v1269_v13  ;;  %v1141_v52 = vadd.f32 %v3778_v45, %v3799_v62  ;;  %v4277_v27 = vld [vmem:[#allocation26_spill] sm:$0xff] }
 0x152   : > { %4276 = vst [vmem:[#allocation32_spill] sm:$0xff] %v3891_v54  ;;  %v1396_v61 = vadd.f32 %v3820_v44, %v1267_v31  ;;  %v1394_v6 = vadd.f32 %v3826_v4, %v1265_v10  ;;  %v1268_v44 = vadd.f32 %v1217_v30, %v1136_v3  ;;  %v3927_v31 = vpop.f32.mrf.mxu1  ;;  %v1647_v55 = vadd.f32 %v1584_v32, %v1515_v18  ;;  %v4278_v10 = vld [vmem:[#allocation14_spill] sm:$0xff] }
 0x153   : > { %v3899_v2 = vpop.f32.mrf.mxu0  ;;  %v1649_v30 = vadd.f32 %v2940_v20, %v1517_v39  ;;  %v1400_v60 = vadd.f32 %v3833_v56, %v1271_v33  ;;  %v3943_v56 = vld [vmem:[%s4237_s2] ss:$0 sm:$0xff]  ;;  %v1272_v40 = vadd.f32 %v3853_v59, %v1140_v0  ;;  %v1520_v9 = vadd.f32 %v4277_v27, %v1398_v35  ;;  %v4286_v33 = vld [vmem:[#allocation13_spill] sm:$0xff] }
 0x154   : > { %v1518_v41 = vadd.f32 %v2923_v53, %v1396_v61  ;;  %v1516_v63 = vadd.f32 %v1455_v1, %v1394_v6  ;;  %v1397_v25 = vadd.f32 %v3831_v50, %v1268_v44  ;;  %v2949_v32 = vpop.f32.mrf.mxu1  ;;  %v1274_v45 = vadd.f32 %v4278_v10, %v1142_v38  ;;  %v4283_v6 = vld [vmem:[#allocation3_spill] sm:$0xff]  ;;  %v4285_v44 = vld [vmem:[#allocation25_spill] sm:$0xff] }
 0x155   : > { %v3905_v54 = vpop.f32.mrf.mxu0  ;;  %v1522_v50 = vadd.f32 %v2927_v19, %v1400_v60  ;;  %v1273_v48 = vadd.f32 %v4279_v11, %v1141_v52  ;;  %v1146_v18 = vadd.f32 %v4283_v6, %v4282_v28  ;;  %v4291_v60 = vld [vmem:[#allocation11_spill] sm:$0xff]  ;;  %v4302_v6 = vld [vmem:[#allocation24_spill] sm:$0xff] }
 0x156   : > { %v1650_v4 = vadd.f32 %v2941_v5, %v1518_v41  ;;  %v1648_v42 = vadd.f32 %v1587_v34, %v1516_v63  ;;  %v1399_v5 = vadd.f32 %v3828_v23, %v1270_v29  ;;  %v1519_v20 = vadd.f32 %v1468_v58, %v1397_v25  ;;  %v1619_v62 = vpop.f32.mrf.mxu1  ;;  %v4284_v41 = vld [vmem:[#allocation12_spill] sm:$0xff]  ;;  %v4289_v25 = vld [vmem:[#allocation9_spill] sm:$0xff]  ;;  %v4299_v10 = vld [vmem:[#allocation23_spill] sm:$0xff] }
 0x157   : > { %v3907_v22 = vpop.f32.mrf.mxu0  ;;  %v1275_v58 = vadd.f32 %v3857_v46, %v1143_v51  ;;  %v4281_v46 = vld [vmem:[#allocation31_spill] sm:$0xff]  ;;  %v1401_v7 = vadd.f32 %v4284_v41, %v1272_v40  ;;  %v1652_v29 = vadd.f32 %v3903_v21, %v1520_v9  ;;  %v4293_v21 = vld [vmem:[#allocation29_spill] sm:$0xff] }
 0x158   : > { %v1521_v24 = vadd.f32 %v3875_v17, %v1399_v5  ;;  %v1651_v61 = vadd.f32 %v4280_v12, %v1519_v20  ;;  %v1654_v3 = vadd.f32 %v4281_v46, %v1522_v50  ;;  %v4292_v51 = vld [vmem:[#allocation15_spill] sm:$0xff]  ;;  %v4295_v50 = vld [vmem:[#allocation10_spill] sm:$0xff]  ;;  %v4297_v40 = vld [vmem:[#allocation21_spill] sm:$0xff] }
 0x159   : > { %v3916_v43 = vpop.f32.mrf.mxu0  ;;  %v1404_v63 = vadd.f32 %v4286_v33, %v1275_v58  ;;  %v1402_v5 = vadd.f32 %v4292_v51, %v1273_v48  ;;  %v4298_v58 = vld [vmem:[#allocation27_spill] sm:$0xff] }
 0x15a   : > { %v1653_v39 = vadd.f32 %v4285_v44, %v1521_v24 }
 0x15b   : > { %v2958_v37 = vpop.f32.mrf.mxu0 }
 0x15c   : > { %v1778_v49 = vadd.f32 %v2958_v37, %v1649_v30  ;;  %v4290_v30 = vld [vmem:[#allocation5_spill] sm:$0xff] }
 0x15d   : > { %v1713_v15 = vpop.f32.mrf.mxu0 }
 0x15e   : > { %v1776_v57 = vadd.f32 %v1713_v15, %v1647_v55  ;;  %v3962_v59 = vadd.f32 %v3943_v56, %v1778_v49  ;;  %v4287_v55 = vld [vmem:[#allocation8_spill] sm:$0xff]  ;;  %v1523_v49 = vadd.f32 %v4293_v21, %v1401_v7 }
 0x15f   : > { %v2959_v53 = vpop.f32.mrf.mxu0 }
 0x160   : > { %v1779_v8 = vadd.f32 %v2959_v53, %v1650_v4  ;;  %v3955_v34 = vadd.f32 %v3943_v56, %v1776_v57  ;;  %v4288_v4 = vld [vmem:[#allocation4_spill] sm:$0xff]  ;;  %v1147_v53 = vadd.f32 %v4290_v30, %v4289_v25  ;;  %v2952_v57 = vpop.f32.mrf.mxu1  ;;  %v1655_v7 = vadd.f32 %v3927_v31, %v1523_v49 }
 0x161   : > { %v1716_v14 = vpop.f32.mrf.mxu0  ;;  %v1144_v38 = vadd.f32 %v4288_v4, %v4287_v55  ;;  %v4305_v31 = vld [vmem:[#allocation16_spill] sm:$0xff] }
 0x162   : > { %v1777_v1 = vadd.f32 %v1716_v14, %v1648_v42  ;;  %v3950_v36 = vadd.f32 %v3943_v56, %v1779_v8  ;;  %v1403_v42 = vadd.f32 %v4291_v60, %v1274_v45  ;;  %v4294_v14 = vld [vmem:[#allocation30_spill] sm:$0xff]  ;;  %v1279_v45 = vadd.f32 %v4299_v10, %v1147_v53 }
 0x163   : > { %v2962_v23 = vpop.f32.mrf.mxu0  ;;  %v1526_v35 = vadd.f32 %v4294_v14, %v1404_v63  ;;  %v1276_v24 = vadd.f32 %v4297_v40, %v1144_v38  ;;  %v4306_v53 = vld [vmem:[#allocation22_spill] sm:$0xff] }
 0x164   : > { %v3958_v19 = vadd.f32 %v3943_v56, %v1777_v1  ;;  %v2006_v37 = vpack.c.bf16 %v3950_v36, %v3962_v59  ;;  %v1782_v8 = vadd.f32 %v2962_v23, %v1653_v39  ;;  %v4296_v1 = vld [vmem:[#allocation6_spill] sm:$0xff]  ;;  %v1525_v27 = vadd.f32 %v4298_v58, %v1403_v42 }
 0x165   : > { %v1729_v17 = vpop.f32.mrf.mxu0  ;;  %v1145_v52 = vadd.f32 %v4296_v1, %v4295_v50  ;;  %v1658_v44 = vadd.f32 %v2949_v32, %v1526_v35 }
 0x166   : > { %v2005_v47 = vpack.c.bf16 %v3958_v19, %v3955_v34  ;;  %v1780_v15 = vadd.f32 %v1729_v17, %v1651_v61  ;;  %v4300_v17 = vld [vmem:[#allocation32_spill] sm:$0xff]  ;;  %v1657_v33 = vadd.f32 %v3914_v26, %v1525_v27 }
 0x167   : > { %v2963_v16 = vpop.f32.mrf.mxu0  ;;  %v1524_v11 = vadd.f32 %v4300_v17, %v1402_v5  ;;  %v4301_v61 = vld [vmem:[#allocation20_spill] sm:$0xff]  ;;  %v1277_v41 = vadd.f32 %v4302_v6, %v1145_v52 }
 0x168   : > { %v1783_v13 = vadd.f32 %v2963_v16, %v1654_v3  ;;  %2992 = vmatprep.mubr.msk.bf16.mxu0 %vm569_vm2, %v2005_v47  ;;  %v3997_v48 = vadd.f32 %v3943_v56, %v1780_v15  ;;  %v1278_v46 = vadd.f32 %v4301_v61, %v1146_v18  ;;  %v1632_v3 = vpop.f32.mrf.mxu1  ;;  %v4004_v47 = vadd.f32 %v3943_v56, %v1782_v8 }
 0x169   : > { %v1732_v0 = vpop.f32.mrf.mxu0  ;;  %2993 = vmatmul.mubr.msk.bf16.vlgmr.msra.gmra.mxu0 %vm569_vm2, %v2006_v37  ;;  %v4303_v37 = vld [vmem:[#allocation17_spill] sm:$0xff]  ;;  %v1406_v26 = vadd.f32 %v4306_v53, %v1277_v41 }
 0x16a   : > { %v1781_v20 = vadd.f32 %v1732_v0, %v1652_v29  ;;  %v3992_v9 = vadd.f32 %v3943_v56, %v1783_v13  ;;  %v1405_v16 = vadd.f32 %v4303_v37, %v1276_v24  ;;  %v4304_v29 = vld [vmem:[#allocation19_spill] sm:$0xff]  ;;  %v1656_v13 = vadd.f32 %v1619_v62, %v1524_v11  ;;  %v2953_v38 = vpop.f32.mrf.mxu1 }
 0x16b   : > { %v2966_v23 = vpop.f32.mrf.mxu0  ;;  %v1408_v15 = vadd.f32 %v4304_v29, %v1279_v45  ;;  %v1407_v32 = vadd.f32 %v4305_v31, %v1278_v46  ;;  %v1528_v5 = vadd.f32 %v3916_v43, %v1406_v26 }
 0x16c   : > { %v4000_v12 = vadd.f32 %v3943_v56, %v1781_v20  ;;  %v2008_v18 = vpack.c.bf16 %v3992_v9, %v4004_v47  ;;  %v1786_v25 = vadd.f32 %v2966_v23, %v1657_v33  ;;  %v1527_v60 = vadd.f32 %v3905_v54, %v1405_v16  ;;  %v1635_v14 = vpop.f32.mrf.mxu1 }
 0x16d   : > { %v1745_v28 = vpop.f32.mrf.mxu0  ;;  %v1530_v42 = vadd.f32 %v3907_v22, %v1408_v15  ;;  %v1529_v62 = vadd.f32 %v3899_v2, %v1407_v32  ;;  %v1660_v52 = vadd.f32 %v1635_v14, %v1528_v5 }
 0x16e   : > { %v2007_v39 = vpack.c.bf16 %v4000_v12, %v3997_v48  ;;  %v1784_v55 = vadd.f32 %v1745_v28, %v1655_v7  ;;  %v4033_v54 = vadd.f32 %v3943_v56, %v1786_v25  ;;  %v1659_v35 = vadd.f32 %v1632_v3, %v1527_v60  ;;  %v2664_v28 = vld [vmem:[%s4239_s4] ss:$0 sm:$0xff] }
 0x16f   : > { %v2967_v63 = vpop.f32.mrf.mxu0  ;;  %v1662_v20 = vadd.f32 %v2953_v38, %v1530_v42  ;;  %v1661_v50 = vadd.f32 %v2952_v57, %v1529_v62 }
 0x170   : > { %v1787_v4 = vadd.f32 %v2967_v63, %v1658_v44  ;;  %2996 = vmatprep.mubr.msk.bf16.mxu0 %vm569_vm2, %v2007_v39  ;;  %v4027_v21 = vadd.f32 %v3943_v56, %v1784_v55 }
 0x171   : > { %v1748_v30 = vpop.f32.mrf.mxu0  ;;  %2997 = vmatmul.mubr.msk.bf16.gmra.mxu0 %vm569_vm2, %v2008_v18 }
 0x172   : > { %v1785_v8 = vadd.f32 %v1748_v30, %v1656_v13  ;;  %v4023_v0 = vadd.f32 %v3943_v56, %v1787_v4 }
 0x173   : > { %v2970_v51 = vpop.f32.mrf.mxu0 }
 0x174   : > { %v4030_v49 = vadd.f32 %v3943_v56, %v1785_v8  ;;  %v2010_v43 = vpack.c.bf16 %v4023_v0, %v4033_v54  ;;  %v1790_v58 = vadd.f32 %v2970_v51, %v1661_v50 }
 0x175   : > { %v1761_v22 = vpop.f32.mrf.mxu0 }
 0x176   : > { %v2009_v2 = vpack.c.bf16 %v4030_v49, %v4027_v21  ;;  %v1788_v40 = vadd.f32 %v1761_v22, %v1659_v35  ;;  %v4051_v17 = vadd.f32 %v3943_v56, %v1790_v58 }
 0x177   : > { %v2971_v1 = vpop.f32.mrf.mxu0 }
 0x178   : > { %v1791_v24 = vadd.f32 %v2971_v1, %v1662_v20  ;;  %3000 = vmatprep.mubr.msk.bf16.mxu0 %vm569_vm2, %v2009_v2  ;;  %v4045_v45 = vadd.f32 %v3943_v56, %v1788_v40 }
 0x179   : > { %v1764_v27 = vpop.f32.mrf.mxu0  ;;  %3001 = vmatmul.mubr.msk.bf16.gmra.mxu0 %vm569_vm2, %v2010_v43 }
 0x17a   : > { %v1789_v23 = vadd.f32 %v1764_v27, %v1660_v52  ;;  %v4042_v10 = vadd.f32 %v3943_v56, %v1791_v24 }
 0x17c   : > { %v4048_v57 = vadd.f32 %v3943_v56, %v1789_v23  ;;  %v2012_v61 = vpack.c.bf16 %v4042_v10, %v4051_v17 }
 0x17e   : > { %v2011_v11 = vpack.c.bf16 %v4048_v57, %v4045_v45 }
 0x180   : > { %3004 = vmatprep.mubr.msk.bf16.mxu0 %vm569_vm2, %v2011_v11 }
 0x181   : > { %3005 = vmatmul.mubr.msk.bf16.gmra.mxu0 %vm569_vm2, %v2012_v61 }
 0x229   : > { %v2994_v46 = vpop.f32.mrf.mxu0 }
 0x22a   : > { %v2091_v7 = vadd.f32 %v2994_v46, %v2664_v28 }
 0x22b   : > { %v2082_v3 = vpop.f32.mrf.mxu0 }
 0x22c   : > { %v2083_v41 = vadd.f32 %v2664_v28, %v2082_v3  ;;  %v2147_v63 = vmax.f32 %v2091_v7, 0.0 }
 0x22d   : > { %v2995_v6 = vpop.f32.mrf.mxu0 }
 0x22e   : > { %v2094_v56 = vadd.f32 %v2995_v6, %v2664_v28  ;;  %v2145_v33 = vmax.f32 %v2083_v41, 0.0 }
 0x22f   : > { %v2085_v44 = vpop.f32.mrf.mxu0 }
 0x230   : > { %v2086_v39 = vadd.f32 %v2664_v28, %v2085_v44  ;;  %v2148_v37 = vmax.f32 %v2094_v56, 0.0 }
 0x231   : > { %v2998_v16 = vpop.f32.mrf.mxu0 }
 0x232   : > { %v2146_v18 = vmax.f32 %v2086_v39, 0.0  ;;  %v2162_v13 = vpack.c.bf16 %v2148_v37, %v2147_v63  ;;  %v2107_v32 = vadd.f32 %v2998_v16, %v2664_v28  ;;  %v4070_v16 = vpop.f32.mrf.mxu1 }
 0x233   : > { %v2098_v29 = vpop.f32.mrf.mxu0 }
 0x234   : > { %v2161_v15 = vpack.c.bf16 %v2146_v18, %v2145_v33  ;;  %v2099_v4 = vadd.f32 %v2664_v28, %v2098_v29  ;;  %v2151_v42 = vmax.f32 %v2107_v32, 0.0  ;;  %v4072_v33 = vpop.f32.mrf.mxu1 }
 0x235   : > { %v2999_v55 = vpop.f32.mrf.mxu0 }
 0x236   : > { %v2110_v31 = vadd.f32 %v2999_v55, %v2664_v28  ;;  %3010 = vmatprep.mubr.msk.bf16.mxu1 %vm569_vm2, %v2161_v15  ;;  %v2149_v26 = vmax.f32 %v2099_v4, 0.0  ;;  %v4074_v18 = vpop.f32.mrf.mxu1 }
 0x237   : > { %v2101_v38 = vpop.f32.mrf.mxu0  ;;  %3011 = vmatmul.mubr.msk.bf16.vlgmr.msra.gmra.mxu1 %vm569_vm2, %v2162_v13 }
 0x238   : > { %v2102_v25 = vadd.f32 %v2664_v28, %v2101_v38  ;;  %v2152_v30 = vmax.f32 %v2110_v31, 0.0  ;;  %v4076_v63 = vpop.f32.mrf.mxu1 }
 0x239   : > { %v3002_v53 = vpop.f32.mrf.mxu0 }
 0x23a   : > { %v2150_v60 = vmax.f32 %v2102_v25, 0.0  ;;  %v2164_v51 = vpack.c.bf16 %v2152_v30, %v2151_v42  ;;  %v2123_v35 = vadd.f32 %v3002_v53, %v2664_v28  ;;  %v4078_v29 = vpop.f32.mrf.mxu1 }
 0x23b   : > { %v2114_v8 = vpop.f32.mrf.mxu0 }
 0x23c   : > { %v2163_v62 = vpack.c.bf16 %v2150_v60, %v2149_v26  ;;  %v2115_v14 = vadd.f32 %v2664_v28, %v2114_v8  ;;  %v2155_v40 = vmax.f32 %v2123_v35, 0.0  ;;  %v4105_v26 = vld [vmem:[%s4241_s6] ss:$0 sm:$0xff] }
 0x23d   : > { %v3003_v5 = vpop.f32.mrf.mxu0 }
 0x23e   : > { %v2126_v22 = vadd.f32 %v3003_v5, %v2664_v28  ;;  %3014 = vmatprep.mubr.msk.bf16.mxu1 %vm569_vm2, %v2163_v62  ;;  %v2153_v1 = vmax.f32 %v2115_v14, 0.0 }
 0x23f   : > { %v2117_v20 = vpop.f32.mrf.mxu0  ;;  %3015 = vmatmul.mubr.msk.bf16.gmra.mxu1 %vm569_vm2, %v2164_v51 }
 0x240   : > { %v2118_v2 = vadd.f32 %v2664_v28, %v2117_v20  ;;  %v2156_v50 = vmax.f32 %v2126_v22, 0.0 }
 0x241   : > { %v3006_v43 = vpop.f32.mrf.mxu0 }
 0x242   : > { %v2154_v52 = vmax.f32 %v2118_v2, 0.0  ;;  %v2166_v27 = vpack.c.bf16 %v2156_v50, %v2155_v40  ;;  %v2139_v46 = vadd.f32 %v3006_v43, %v2664_v28 }
 0x243   : > { %v2130_v24 = vpop.f32.mrf.mxu0 }
 0x244   : > { %v2165_v58 = vpack.c.bf16 %v2154_v52, %v2153_v1  ;;  %v2131_v11 = vadd.f32 %v2664_v28, %v2130_v24  ;;  %v2159_v44 = vmax.f32 %v2139_v46, 0.0 }
 0x245   : > { %v3007_v23 = vpop.f32.mrf.mxu0 }
 0x246   : > { %v2142_v61 = vadd.f32 %v3007_v23, %v2664_v28  ;;  %3018 = vmatprep.mubr.msk.bf16.mxu1 %vm569_vm2, %v2165_v58  ;;  %v2157_v56 = vmax.f32 %v2131_v11, 0.0 }
 0x247   : > { %v2133_v3 = vpop.f32.mrf.mxu0  ;;  %3019 = vmatmul.mubr.msk.bf16.gmra.mxu1 %vm569_vm2, %v2166_v27 }
 0x248   : > { %v2134_v6 = vadd.f32 %v2664_v28, %v2133_v3  ;;  %v2160_v41 = vmax.f32 %v2142_v61, 0.0  ;;  %v4080_v28 = vpop.f32.mrf.mxu1 }
 0x24a   : > { %v2158_v7 = vmax.f32 %v2134_v6, 0.0  ;;  %v2168_v37 = vpack.c.bf16 %v2160_v41, %v2159_v44  ;;  %v4082_v15 = vpop.f32.mrf.mxu1 }
 0x24c   : > { %v2167_v39 = vpack.c.bf16 %v2158_v7, %v2157_v56  ;;  %v4084_v13 = vpop.f32.mrf.mxu1 }
 0x24e   : > { %3022 = vmatprep.mubr.msk.bf16.mxu1 %vm569_vm2, %v2167_v39  ;;  %v4086_v55 = vpop.f32.mrf.mxu1 }
 0x24f   : > { %3023 = vmatmul.mubr.msk.bf16.gmra.mxu1 %vm569_vm2, %v2168_v37 }
 0x250   : > { %v4088_v4 = vpop.f32.mrf.mxu1 }
 0x252   : > { %v4090_v31 = vpop.f32.mrf.mxu1 }
 0x254   : > { %v4092_v32 = vpop.f32.mrf.mxu1 }
 0x256   : > { %v4094_v38 = vpop.f32.mrf.mxu1 }
 0x258   : > { %v4096_v25 = vpop.f32.mrf.mxu1 }
 0x25a   : > { %v4098_v30 = vpop.f32.mrf.mxu1 }
 0x25c   : > { %v4100_v53 = vpop.f32.mrf.mxu1 }
 0x2f7   : > { %v3012_v60 = vpop.f32.mrf.mxu1 }
 0x2f8   : > { %v2247_v42 = vadd.f32 %v3012_v60, %v4105_v26 }
 0x2f9   : > { %v2238_v8 = vpop.f32.mrf.mxu1 }
 0x2fa   : > { %v2684_v62 = vmul.f32 -1.442695, %v2247_v42  ;;  %v2239_v51 = vadd.f32 %v4105_v26, %v2238_v8 }
 0x2fb   : > { %v3013_v5 = vpop.f32.mrf.mxu1 }
 0x2fc   : > { %3075 = vpow2.f32 %v2684_v62  ;;  %v2682_v14 = vmul.f32 -1.442695, %v2239_v51  ;;  %v2250_v22 = vadd.f32 %v3013_v5, %v4105_v26 }
 0x2fd   : > { %v2241_v35 = vpop.f32.mrf.mxu1 }
 0x2fe   : > { %3077 = vpow2.f32 %v2682_v14  ;;  %v2685_v20 = vmul.f32 -1.442695, %v2250_v22  ;;  %v2242_v2 = vadd.f32 %v4105_v26, %v2241_v35 }
 0x2ff   : > { %v3016_v50 = vpop.f32.mrf.mxu1 }
 0x300   : > { %3079 = vpow2.f32 %v2685_v20  ;;  %v2683_v43 = vmul.f32 -1.442695, %v2242_v2  ;;  %v2263_v1 = vadd.f32 %v3016_v50, %v4105_v26 }
 0x301   : > { %v2254_v52 = vpop.f32.mrf.mxu1 }
 0x302   : > { %3081 = vpow2.f32 %v2683_v43  ;;  %v2688_v40 = vmul.f32 -1.442695, %v2263_v1  ;;  %v2255_v24 = vadd.f32 %v4105_v26, %v2254_v52 }
 0x303   : > { %v3017_v58 = vpop.f32.mrf.mxu1 }
 0x304   : > { %3083 = vpow2.f32 %v2688_v40  ;;  %v2686_v27 = vmul.f32 -1.442695, %v2255_v24  ;;  %v2266_v23 = vadd.f32 %v3017_v58, %v4105_v26 }
 0x305   : > { %v2257_v11 = vpop.f32.mrf.mxu1 }
 0x306   : > { %3085 = vpow2.f32 %v2686_v27  ;;  %v2689_v61 = vmul.f32 -1.442695, %v2266_v23  ;;  %v2258_v46 = vadd.f32 %v4105_v26, %v2257_v11 }
 0x307   : > { %v3020_v3 = vpop.f32.mrf.mxu1 }
 0x308   : > { %3087 = vpow2.f32 %v2689_v61  ;;  %v2687_v6 = vmul.f32 -1.442695, %v2258_v46  ;;  %v2279_v41 = vadd.f32 %v3020_v3, %v4105_v26 }
 0x309   : > { %v3076_v56 = vpop.eup %3075  ;;  %v2270_v7 = vpop.f32.mrf.mxu1 }
 0x30a   : > { %v2351_v44 = vadd.f32 1.0, %v3076_v56  ;;  %3089 = vpow2.f32 %v2687_v6  ;;  %v2692_v39 = vmul.f32 -1.442695, %v2279_v41  ;;  %v2271_v37 = vadd.f32 %v4105_v26, %v2270_v7 }
 0x30b   : > { %v3078_v60 = vpop.eup %3077  ;;  %v3021_v42 = vpop.f32.mrf.mxu1 }
 0x30c   : > { %3091 = vrcp.f32 %v2351_v44  ;;  %v2349_v8 = vadd.f32 1.0, %v3078_v60  ;;  %v2690_v62 = vmul.f32 -1.442695, %v2271_v37  ;;  %v2282_v51 = vadd.f32 %v3021_v42, %v4105_v26 }
 0x30d   : > { %v3080_v5 = vpop.eup %3079  ;;  %3093 = vpow2.f32 %v2692_v39  ;;  %v2273_v14 = vpop.f32.mrf.mxu1 }
 0x30e   : > { %3095 = vrcp.f32 %v2349_v8  ;;  %v2352_v22 = vadd.f32 1.0, %v3080_v5  ;;  %v2693_v35 = vmul.f32 -1.442695, %v2282_v51  ;;  %v2274_v20 = vadd.f32 %v4105_v26, %v2273_v14  ;;  %v4126_v14 = vld [vmem:[%s4244_s9] ss:$0 sm:$0xff] }
 0x30f   : > { %v3082_v2 = vpop.eup %3081  ;;  %3097 = vpow2.f32 %v2690_v62  ;;  %v3024_v50 = vpop.f32.mrf.mxu1 }
 0x310   : > { %3099 = vrcp.f32 %v2352_v22  ;;  %v2350_v43 = vadd.f32 1.0, %v3082_v2  ;;  %v2691_v1 = vmul.f32 -1.442695, %v2274_v20  ;;  %v2295_v52 = vadd.f32 %v3024_v50, %v4105_v26 }
 0x311   : > { %v3084_v40 = vpop.eup %3083  ;;  %3101 = vpow2.f32 %v2693_v35  ;;  %v2286_v24 = vpop.f32.mrf.mxu1  ;;  %v4128_v22 = vstv %s2429_s10 }
 0x312   : > { %3103 = vrcp.f32 %v2350_v43  ;;  %v2355_v58 = vadd.f32 1.0, %v3084_v40  ;;  %v2696_v27 = vmul.f32 -1.442695, %v2295_v52  ;;  %v2287_v23 = vadd.f32 %v4105_v26, %v2286_v24 }
 0x313   : > { %v3086_v11 = vpop.eup %3085  ;;  %3105 = vpow2.f32 %v2691_v1  ;;  %v3025_v61 = vpop.f32.mrf.mxu1  ;;  %v1951_v52 = vadd.f32 %v4070_v16, %v4126_v14 }
 0x314   : > { %3107 = vrcp.f32 %v2355_v58  ;;  %v2353_v46 = vadd.f32 1.0, %v3086_v11  ;;  %v2694_v3 = vmul.f32 -1.442695, %v2287_v23  ;;  %v2298_v6 = vadd.f32 %v3025_v61, %v4105_v26 }
 0x315   : > { %v3088_v41 = vpop.eup %3087  ;;  %3109 = vpow2.f32 %v2696_v27  ;;  %v2289_v56 = vpop.f32.mrf.mxu1  ;;  %v1943_v23 = vadd.f32 %v4126_v14, %v4072_v33  ;;  %v1954_v33 = vadd.f32 %v4074_v18, %v4126_v14 }
 0x316   : > { %3111 = vrcp.f32 %v2353_v46  ;;  %v2356_v7 = vadd.f32 1.0, %v3088_v41  ;;  %v2697_v44 = vmul.f32 -1.442695, %v2298_v6  ;;  %v2290_v39 = vadd.f32 %v4105_v26, %v2289_v56 }
 0x317   : > { %v3090_v37 = vpop.eup %3089  ;;  %3113 = vpow2.f32 %v2694_v3 }
 0x318   : > { %3115 = vrcp.f32 %v2356_v7  ;;  %v2354_v60 = vadd.f32 1.0, %v3090_v37  ;;  %v2695_v42 = vmul.f32 -1.442695, %v2290_v39 }
 0x319   : > { %v3092_v8 = vpop.eup %3091  ;;  %3117 = vpow2.f32 %v2697_v44 }
 0x31a   : > { %v3094_v62 = vpop.eup %3093  ;;  %v2399_v51 = vmul.f32 2.0, %v3092_v8  ;;  %3119 = vrcp.f32 %v2354_v60 }
 0x31b   : > { %v3096_v5 = vpop.eup %3095  ;;  %v2359_v26 = vadd.f32 1.0, %v3094_v62  ;;  %3121 = vpow2.f32 %v2695_v42 }
 0x31c   : > { %v3098_v35 = vpop.eup %3097  ;;  %v2415_v20 = vmul.f32 %v2399_v51, %v3962_v59  ;;  %v2397_v2 = vmul.f32 2.0, %v3096_v5 }
 0x31d   : > { %v3100_v50 = vpop.eup %3099  ;;  %3123 = vrcp.f32 %v2359_v26  ;;  %v2357_v43 = vadd.f32 1.0, %v3098_v35 }
 0x31e   : > { %v3102_v1 = vpop.eup %3101  ;;  %v2433_v40 = vmul.f32 %v4128_v22, %v2415_v20  ;;  %v2413_v24 = vmul.f32 %v2397_v2, %v3955_v34  ;;  %v2400_v58 = vmul.f32 2.0, %v3100_v50 }
 0x31f   : > { %v3104_v27 = vpop.eup %3103  ;;  %3125 = vrcp.f32 %v2357_v43  ;;  %v2360_v59 = vadd.f32 1.0, %v3102_v1 }
 0x320   : > { %v3106_v11 = vpop.eup %3105  ;;  %v2449_v61 = vadd.f32 %v2433_v40, %v1951_v52  ;;  %v2431_v16 = vmul.f32 %v4128_v22, %v2413_v24  ;;  %v2416_v46 = vmul.f32 %v2400_v58, %v3950_v36  ;;  %v2398_v34 = vmul.f32 2.0, %v3104_v27 }
 0x321   : > { %v3108_v3 = vpop.eup %3107  ;;  %3127 = vrcp.f32 %v2360_v59  ;;  %v2358_v6 = vadd.f32 1.0, %v3106_v11  ;;  %v1946_v36 = vadd.f32 %v4126_v14, %v4076_v63 }
 0x322   : > { %v3110_v41 = vpop.eup %3109  ;;  %2465 = vst.msk [vmem:[%s4141_s27 + $0x10] sm:$0xff] %vm569_vm2, %v2449_v61  ;;  %v2447_v56 = vadd.f32 %v2431_v16, %v1943_v23  ;;  %v2434_v7 = vmul.f32 %v4128_v22, %v2416_v46  ;;  %v2414_v44 = vmul.f32 %v2398_v34, %v3958_v19  ;;  %v2403_v39 = vmul.f32 2.0, %v3108_v3 }
 0x323   : > { %v3112_v37 = vpop.eup %3111  ;;  %3129 = vrcp.f32 %v2358_v6  ;;  %v2363_v60 = vadd.f32 1.0, %v3110_v41  ;;  %v1967_v19 = vadd.f32 %v4078_v29, %v4126_v14  ;;  %v1970_v23 = vadd.f32 %v4082_v15, %v4126_v14 }
 0x324   : > { %v3114_v42 = vpop.eup %3113  ;;  %2463 = vst.msk [vmem:[%s4141_s27] sm:$0xff] %vm569_vm2, %v2447_v56  ;;  %v2450_v18 = vadd.f32 %v2434_v7, %v1954_v33  ;;  %v2432_v8 = vmul.f32 %v4128_v22, %v2414_v44  ;;  %v2419_v62 = vmul.f32 %v2403_v39, %v4004_v47  ;;  %v2401_v51 = vmul.f32 2.0, %v3112_v37 }
 0x325   : > { %v3116_v5 = vpop.eup %3115  ;;  %3131 = vrcp.f32 %v2363_v60  ;;  %v2361_v26 = vadd.f32 1.0, %v3114_v42  ;;  %v1959_v47 = vadd.f32 %v4126_v14, %v4080_v28  ;;  %v1983_v6 = vadd.f32 %v4086_v55, %v4126_v14 }
 0x326   : > { %v3118_v35 = vpop.eup %3117  ;;  %2466 = vst.msk [vmem:[%s4141_s27 + $0x18] sm:$0xff] %vm569_vm2, %v2450_v18  ;;  %v2448_v63 = vadd.f32 %v2432_v8, %v1946_v36  ;;  %v2437_v20 = vmul.f32 %v4128_v22, %v2419_v62  ;;  %v2417_v2 = vmul.f32 %v2401_v51, %v3997_v48  ;;  %v2404_v50 = vmul.f32 2.0, %v3116_v5 }
 0x327   : > { %v3120_v43 = vpop.eup %3119  ;;  %3133 = vrcp.f32 %v2361_v26  ;;  %v2364_v1 = vadd.f32 1.0, %v3118_v35  ;;  %v1975_v44 = vadd.f32 %v4126_v14, %v4088_v4  ;;  %v1986_v55 = vadd.f32 %v4090_v31, %v4126_v14 }
 0x328   : > { %v3122_v52 = vpop.eup %3121  ;;  %2464 = vst.msk [vmem:[%s4141_s27 + $0x8] sm:$0xff] %vm569_vm2, %v2448_v63  ;;  %v2453_v29 = vadd.f32 %v2437_v20, %v1967_v19  ;;  %v2435_v40 = vmul.f32 %v4128_v22, %v2417_v2  ;;  %v2420_v24 = vmul.f32 %v2404_v50, %v3992_v9  ;;  %v2402_v58 = vmul.f32 2.0, %v3120_v43 }
 0x329   : > { %3135 = vrcp.f32 %v2364_v1  ;;  %v2362_v48 = vadd.f32 1.0, %v3122_v52  ;;  %v1962_v9 = vadd.f32 %v4126_v14, %v4084_v13  ;;  %v1978_v62 = vadd.f32 %v4126_v14, %v4092_v32 }
 0x32a   : > { %v3124_v27 = vpop.eup %3123  ;;  %2469 = vst.msk [vmem:[%s4141_s27 + $0x30] sm:$0xff] %vm569_vm2, %v2453_v29  ;;  %v2451_v28 = vadd.f32 %v2435_v40, %v1959_v47  ;;  %v2438_v59 = vmul.f32 %v4128_v22, %v2420_v24  ;;  %v2418_v11 = vmul.f32 %v2402_v58, %v4000_v12  ;;  %v1999_v26 = vadd.f32 %v4094_v38, %v4126_v14 }
 0x32b   : > { %v2407_v61 = vmul.f32 2.0, %v3124_v27  ;;  %3137 = vrcp.f32 %v2362_v48  ;;  %v2002_v47 = vadd.f32 %v4098_v30, %v4126_v14 }
 0x32c   : > { %v3126_v16 = vpop.eup %3125  ;;  %2467 = vst.msk [vmem:[%s4141_s27 + $0x20] sm:$0xff] %vm569_vm2, %v2451_v28  ;;  %v2454_v46 = vadd.f32 %v2438_v59, %v1970_v23  ;;  %v2436_v34 = vmul.f32 %v4128_v22, %v2418_v11 }
 0x32d   : > { %v2423_v15 = vmul.f32 %v2407_v61, %v4033_v54  ;;  %v2405_v3 = vmul.f32 2.0, %v3126_v16 }
 0x32e   : > { %v3128_v33 = vpop.eup %3127  ;;  %2470 = vst.msk [vmem:[%s4141_s27 + $0x38] sm:$0xff] %vm569_vm2, %v2454_v46  ;;  %v2452_v12 = vadd.f32 %v2436_v34, %v1962_v9 }
 0x32f   : > { %v2441_v41 = vmul.f32 %v4128_v22, %v2423_v15  ;;  %v2421_v13 = vmul.f32 %v2405_v3, %v4027_v21  ;;  %v2408_v56 = vmul.f32 2.0, %v3128_v33 }
 0x330   : > { %v3130_v7 = vpop.eup %3129  ;;  %2468 = vst.msk [vmem:[%s4141_s27 + $0x28] sm:$0xff] %vm569_vm2, %v2452_v12 }
 0x331   : > { %v2457_v54 = vadd.f32 %v2441_v41, %v1983_v6  ;;  %v2439_v39 = vmul.f32 %v4128_v22, %v2421_v13  ;;  %v2424_v37 = vmul.f32 %v2408_v56, %v4023_v0  ;;  %v2406_v36 = vmul.f32 2.0, %v3130_v7 }
 0x332   : > { %v3132_v60 = vpop.eup %3131 }
 0x333   : > { %2473 = vst.msk [vmem:[%s4141_s27 + $0x50] sm:$0xff] %vm569_vm2, %v2457_v54  ;;  %v2455_v21 = vadd.f32 %v2439_v39, %v1975_v44  ;;  %v2442_v42 = vmul.f32 %v4128_v22, %v2424_v37  ;;  %v2422_v4 = vmul.f32 %v2406_v36, %v4030_v49  ;;  %v2411_v18 = vmul.f32 2.0, %v3132_v60 }
 0x334   : > { %v3134_v8 = vpop.eup %3133 }
 0x335   : > { %2471 = vst.msk [vmem:[%s4141_s27 + $0x40] sm:$0xff] %vm569_vm2, %v2455_v21  ;;  %v2458_v0 = vadd.f32 %v2442_v42, %v1986_v55  ;;  %v2440_v51 = vmul.f32 %v4128_v22, %v2422_v4  ;;  %v2427_v31 = vmul.f32 %v2411_v18, %v4051_v17  ;;  %v2409_v5 = vmul.f32 2.0, %v3134_v8 }
 0x336   : > { %v3136_v19 = vpop.eup %3135  ;;  %v1991_v17 = vadd.f32 %v4126_v14, %v4096_v25  ;;  %v1994_v25 = vadd.f32 %v4126_v14, %v4100_v53 }
 0x337   : > { %2474 = vst.msk [vmem:[%s4141_s27 + $0x58] sm:$0xff] %vm569_vm2, %v2458_v0  ;;  %v2456_v49 = vadd.f32 %v2440_v51, %v1978_v62  ;;  %v2445_v35 = vmul.f32 %v4128_v22, %v2427_v31  ;;  %v2425_v32 = vmul.f32 %v2409_v5, %v4045_v45  ;;  %v2412_v63 = vmul.f32 2.0, %v3136_v19 }
 0x338   : > { %v3138_v20 = vpop.eup %3137 }
 0x339   : > { %2472 = vst.msk [vmem:[%s4141_s27 + $0x48] sm:$0xff] %vm569_vm2, %v2456_v49  ;;  %v2461_v2 = vadd.f32 %v2445_v35, %v1999_v26  ;;  %v2443_v38 = vmul.f32 %v4128_v22, %v2425_v32  ;;  %v2428_v50 = vmul.f32 %v2412_v63, %v4042_v10  ;;  %v2410_v43 = vmul.f32 2.0, %v3138_v20 }
 0x33b   : > { %2477 = vst.msk [vmem:[%s4141_s27 + $0x70] sm:$0xff] %vm569_vm2, %v2461_v2  ;;  %v2459_v45 = vadd.f32 %v2443_v38, %v1991_v17  ;;  %v2446_v1 = vmul.f32 %v4128_v22, %v2428_v50  ;;  %v2426_v52 = vmul.f32 %v2410_v43, %v4048_v57 }
 0x33d   : > { %2475 = vst.msk [vmem:[%s4141_s27 + $0x60] sm:$0xff] %vm569_vm2, %v2459_v45  ;;  %v2462_v29 = vadd.f32 %v2446_v1, %v2002_v47  ;;  %v2444_v40 = vmul.f32 %v4128_v22, %v2426_v52 }
 0x33f   : > { %2478 = vst.msk [vmem:[%s4141_s27 + $0x78] sm:$0xff] %vm569_vm2, %v2462_v29  ;;  %v2460_v10 = vadd.f32 %v2444_v40, %v1994_v25 }
 0x341   : > { %2476 = vst.msk [vmem:[%s4141_s27 + $0x68] sm:$0xff] %vm569_vm2, %v2460_v10 }
 0x342 PF: > { %s22_s19 = sadd.s32 1, %s3145_s19  }
 0x343   : > { %p19_p4 = scmp.ge.s32.totalorder %s22_s19, 6  }
 0x345   :  { %21 = sbr.rel (!%p19_p4) target bundleno = 2 (0x2), region = 105 }

</bundles_post_ra>
